<compile_context>
chip_gen: v5e
topology: v5e:2x2
jax: 0.10.0
libtpu: 0.0.40
codegen_flags: <defaults>
</compile_context>

<pallas_src>
import numpy as np

import jax
import jax.numpy as jnp
from jax import lax
from jax.experimental import pallas as pl
from jax.experimental.pallas import tpu as pltpu

BN_EPS = 1e-5
NEG_SLOPE = 0.2  # LeakyReLU(0.2) in the torch module


# ----------------------------------------------------------------------------
# Pallas kernel: whole Discriminator forward in one call, everything in VMEM
# ----------------------------------------------------------------------------
def _make_disc_kernel(num_layers):
    """Positional refs:
         x0                       (N*H0, W0*C0)      bf16  input image rows
         for each conv layer l:
           S_l                    (4, N*OH, N*H_in)  bf16  0/1 row-gather per tap
           B_l                    (4, W_in*Cin, OW*Cout) bf16 folded weights
           bias_l                 (1, OW*Cout)       f32   folded BN shift
         fmask                    (N*f, f*C_last)    f32   final conv weights
         sn                       (N, N*f)           f32   per-sample row sum
         out                      (N, 1)             f32
    """

    def kernel(*refs):
        x = refs[0][...]                                  # (N*H0, W0*C0) bf16
        fmask_ref = refs[1 + 3 * num_layers]
        sn_ref = refs[2 + 3 * num_layers]
        o_ref = refs[3 + 3 * num_layers]

        for l in range(num_layers):                       # static: shapes differ
            s_ref = refs[1 + 3 * l]
            b_ref = refs[2 + 3 * l]
            bias_ref = refs[3 + 3 * l]
            acc = None
            for kh in range(4):                           # 4 vertical taps
                # Row gather (exact: S is 0/1, x already bf16).
                g = jnp.dot(s_ref[kh], x, preferred_element_type=jnp.float32)
                # Horizontal taps + channel mixing.
                p = jnp.dot(g.astype(jnp.bfloat16), b_ref[kh],
                            preferred_element_type=jnp.float32)
                acc = p if acc is None else acc + p
            pre = acc + bias_ref[...]                     # folded BN shift
            x = jnp.where(pre >= 0, pre, NEG_SLOPE * pre).astype(jnp.bfloat16)

        # Final conv: kernel covers the whole fxf map, stride 1, no padding,
        # no nonlinearity -> masked multiply + per-sample row sum + lane reduce.
        z = x.astype(jnp.float32) * fmask_ref[...]        # (N*f, f*C_last)
        y = jnp.dot(sn_ref[...], z, preferred_element_type=jnp.float32)  # (N, f*C)
        o_ref[...] = jnp.sum(y, axis=1, keepdims=True)    # (N, 1)

    return kernel


# ----------------------------------------------------------------------------
# Host-side (one-time) parameter folding:
#   - BatchNorm folded into the conv weights / a per-layer bias row
#   - each conv lowered to 4 tap matrices B_kh + 4 tiny row-gather matrices S_kh
# ----------------------------------------------------------------------------
def prepare_params(params, batch_size):
    convs = params["convs"]
    image_size = params["image_size"]

    layers = []
    cur = image_size
    for i, layer in enumerate(convs):
        w = np.asarray(jax.device_get(layer["w"]), np.float32)    # (Cout,Cin,4,4)
        cout, cin, _, _ = w.shape
        if i > 0:
            gamma = np.asarray(jax.device_get(layer["gamma"]), np.float32)
            beta = np.asarray(jax.device_get(layer["beta"]), np.float32)
            mean = np.asarray(jax.device_get(layer["mean"]), np.float32)
            var = np.asarray(jax.device_get(layer["var"]), np.float32)
            scale = gamma / np.sqrt(var + BN_EPS)
            shift = beta - mean * scale
            wf = w * scale[:, None, None, None]
        else:
            wf = w
            shift = np.zeros((cout,), np.float32)

        h_in = cur                     # square spatial
        oh = h_in // 2

        # Row-gather matrices: S[kh, (n,oh), (n,h)] = 1 iff h == 2*oh + kh - 1
        # (vertical zero-padding handled by simply omitting out-of-range rows).
        S = np.zeros((4, batch_size * oh, batch_size * h_in), np.float32)
        for kh in range(4):
            for n in range(batch_size):
                for o in range(oh):
                    hh = 2 * o + kh - 1
                    if 0 <= hh < h_in:
                        S[kh, n * oh + o, n * h_in + hh] = 1.0

        # Horizontal-tap / channel-mix matrices:
        # B[kh, (w,ci), (ow,co)] = wf[co, ci, kh, kw] with w = 2*ow + kw - 1.
        Bm = np.zeros((4, h_in * cin, oh * cout), np.float32)
        for kh in range(4):
            for ow in range(oh):
                for kw in range(4):
                    ww = 2 * ow + kw - 1
                    if 0 <= ww < h_in:
                        Bm[kh, ww * cin:(ww + 1) * cin,
                           ow * cout:(ow + 1) * cout] = wf[:, :, kh, kw].T

        bias = np.tile(shift, oh).reshape(1, oh * cout)   # broadcast over ow
        layers.append((jnp.asarray(S, jnp.bfloat16),
                       jnp.asarray(Bm, jnp.bfloat16),
                       jnp.asarray(bias, jnp.float32)))
        cur = oh

    # Final conv (kernel_size == remaining spatial extent, stride 1, pad 0):
    # fmask[(n,h), (w,ci)] = w_final[0, ci, h, w];  sn sums each sample's rows.
    wfin = np.asarray(jax.device_get(params["w_final"]), np.float32)  # (1,C,f,f)
    c_last, f_sp = wfin.shape[1], wfin.shape[2]
    per = np.zeros((f_sp, f_sp * c_last), np.float32)
    for hh in range(f_sp):
        per[hh] = wfin[0, :, hh, :].T.reshape(-1)
    fmask = np.tile(per, (batch_size, 1))
    sn = np.kron(np.eye(batch_size, dtype=np.float32),
                 np.ones((1, f_sp), np.float32))

    return {
        "layers": layers,
        "fmask": jnp.asarray(fmask, jnp.float32),
        "sn": jnp.asarray(sn, jnp.float32),
    }


# ----------------------------------------------------------------------------
# Forward pass (single fused pallas_call) and pure-JAX reference
# ----------------------------------------------------------------------------
def discriminator_forward(x_nchw, folded):
    n, c, h, w = x_nchw.shape
    x_nhwc = jnp.transpose(x_nchw, (0, 2, 3, 1)).astype(jnp.float32)
    a0 = x_nhwc.reshape(n * h, w * c).astype(jnp.bfloat16)    # rows=(n,h), cols=(w,c)

    layers = folded["layers"]
    inputs = [a0]
    for s, b, bias in layers:
        inputs += [s, b, bias]
    inputs += [folded["fmask"], folded["sn"]]

    # Modest, size-derived VMEM budget (raw inputs are well under 1 MiB).
    raw_bytes = sum(int(np.prod(a.shape)) * a.dtype.itemsize for a in inputs)
    vmem_limit = int(min(32 * 2 ** 20, max(8 * 2 ** 20, 8 * raw_bytes)))

    kernel = _make_disc_kernel(len(layers))
    out = pl.pallas_call(
        kernel,
        out_shape=jax.ShapeDtypeStruct((n, 1), jnp.float32),
        # Single grid step: whole arrays resident in VMEM, no double-buffering.
        in_specs=[pl.BlockSpec(memory_space=pltpu.MemorySpace.VMEM)] * len(inputs),
        out_specs=pl.BlockSpec(memory_space=pltpu.MemorySpace.VMEM),
        compiler_params=pltpu.CompilerParams(vmem_limit_bytes=vmem_limit),
    )(*inputs)
    return out.reshape(n, 1, 1, 1)


def ref_forward(x_nchw, params):
    h = x_nchw.astype(jnp.float32)
    for i, layer in enumerate(params["convs"]):
        h = lax.conv_general_dilated(
            h, layer["w"], (2, 2), ((1, 1), (1, 1)),
            dimension_numbers=("NCHW", "OIHW", "NCHW"),
            precision=lax.Precision.HIGHEST)
        if i > 0:
            inv = lax.rsqrt(layer["var"] + BN_EPS).reshape(1, -1, 1, 1)
            h = (h - layer["mean"].reshape(1, -1, 1, 1)) * inv \
                * layer["gamma"].reshape(1, -1, 1, 1) + layer["beta"].reshape(1, -1, 1, 1)
        h = jnp.where(h >= 0, h, NEG_SLOPE * h)
    h = lax.conv_general_dilated(
        h, params["w_final"], (1, 1), ((0, 0), (0, 0)),
        dimension_numbers=("NCHW", "OIHW", "NCHW"),
        precision=lax.Precision.HIGHEST)
    return h


# ----------------------------------------------------------------------------
# Parameters (deterministic synthetic init; shapes follow the torch module)
# ----------------------------------------------------------------------------
def init_params(key, input_channels=3, hidden_dims=(4, 8, 16, 32), image_size=48):
    num_layers, cur = 0, image_size
    while cur > 4 and num_layers < len(hidden_dims):
        cur //= 2
        num_layers += 1
    dims = hidden_dims[:num_layers]

    convs = []
    cin = input_channels
    for i, hdim in enumerate(dims):
        key, k1, k2, k3, k4, k5 = jax.random.split(key, 6)
        w = jax.random.normal(k1, (hdim, cin, 4, 4), jnp.float32) / jnp.sqrt(16.0 * cin)
        layer = {"w": w}
        if i > 0:
            layer["gamma"] = 1.0 + 0.1 * jax.random.normal(k2, (hdim,), jnp.float32)
            layer["beta"] = 0.1 * jax.random.normal(k3, (hdim,), jnp.float32)
            layer["mean"] = 0.1 * jax.random.normal(k4, (hdim,), jnp.float32)
            layer["var"] = 1.0 + 0.2 * jnp.abs(jax.random.normal(k5, (hdim,), jnp.float32))
        convs.append(layer)
        cin = hdim
    fsd = image_size // (2 ** len(dims))
    key, kf = jax.random.split(key)
    w_final = jax.random.normal(kf, (1, cin, fsd, fsd), jnp.float32) \
        / jnp.sqrt(float(cin * fsd * fsd))
    return {"convs": convs, "w_final": w_final,
            "image_size": image_size, "input_channels": input_channels}


if __name__ == "__main__":
    key = jax.random.PRNGKey(0)
    k_x, k_p = jax.random.split(key)
    # Module defaults: input_channels=3, image_size=48 -> 4 conv layers + final 3x3.
    x = jax.random.normal(k_x, (2, 3, 48, 48), jnp.float32)
    params = init_params(k_p)
    folded = prepare_params(params, batch_size=x.shape[0])   # one-time host folding

    fwd = jax.jit(discriminator_forward)
    out = fwd(x, folded)
    jax.block_until_ready(out)

    ref = ref_forward(x, params)
    assert out.shape == ref.shape == (2, 1, 1, 1)
    assert bool(jnp.all(jnp.isfinite(out)))
    err = float(jnp.max(jnp.abs(out - ref)))
    scale = float(jnp.max(jnp.abs(ref)))
    # bf16 matmul operands with f32 accumulation: error is dominated by bf16
    # rounding of weights/activations (~1% relative through 5 layers).
    assert err <= 2e-2 * scale + 2e-2, (err, scale)
    print("KERNEL_OK")
</pallas_src>

<mosaic_0001>
module attributes {stable_mosaic.version = 11 : i64} {
  func.func @kernel(%arg0: memref<96x144xbf16, #tpu.memory_space<vmem>>, %arg1: memref<4x48x96xbf16, #tpu.memory_space<vmem>>, %arg2: memref<4x144x96xbf16, #tpu.memory_space<vmem>>, %arg3: memref<1x96xf32, #tpu.memory_space<vmem>>, %arg4: memref<4x24x48xbf16, #tpu.memory_space<vmem>>, %arg5: memref<4x96x96xbf16, #tpu.memory_space<vmem>>, %arg6: memref<1x96xf32, #tpu.memory_space<vmem>>, %arg7: memref<4x12x24xbf16, #tpu.memory_space<vmem>>, %arg8: memref<4x96x96xbf16, #tpu.memory_space<vmem>>, %arg9: memref<1x96xf32, #tpu.memory_space<vmem>>, %arg10: memref<4x6x12xbf16, #tpu.memory_space<vmem>>, %arg11: memref<4x96x96xbf16, #tpu.memory_space<vmem>>, %arg12: memref<1x96xf32, #tpu.memory_space<vmem>>, %arg13: memref<6x96xf32, #tpu.memory_space<vmem>>, %arg14: memref<2x6xf32, #tpu.memory_space<vmem>>, %arg15: memref<2x1xf32, #tpu.memory_space<vmem>>) attributes {dimension_semantics = [], scalar_prefetch = 0 : i64, scratch_operands = 0 : i64, tpu.core_type = #tpu.core_type<tc>} {
    %c0 = arith.constant 0 : index
    %c0_0 = arith.constant 0 : index
    %0 = vector.load %arg0[%c0, %c0_0] : memref<96x144xbf16, #tpu.memory_space<vmem>>, vector<96x144xbf16>
    %c0_1 = arith.constant 0 : index
    %c0_2 = arith.constant 0 : index
    %c0_3 = arith.constant 0 : index
    %1 = vector.load %arg1[%c0_1, %c0_2, %c0_3] : memref<4x48x96xbf16, #tpu.memory_space<vmem>>, vector<1x48x96xbf16>
    %2 = vector.shape_cast %1 : vector<1x48x96xbf16> to vector<48x96xbf16>
    %cst = arith.constant dense<0.000000e+00> : vector<48x144xf32>
    %3 = tpu.matmul %2, %0, %cst {dimension_numbers = #tpu.dot_dimension_numbers<[1], [0], [0], [1], [0, 0, 1, 1], [], []>} : vector<48x96xbf16>, vector<96x144xbf16>, vector<48x144xf32> -> vector<48x144xf32>
    %4 = arith.truncf %3 : vector<48x144xf32> to vector<48x144xbf16>
    %c0_4 = arith.constant 0 : index
    %c0_5 = arith.constant 0 : index
    %c0_6 = arith.constant 0 : index
    %5 = vector.load %arg2[%c0_4, %c0_5, %c0_6] : memref<4x144x96xbf16, #tpu.memory_space<vmem>>, vector<1x144x96xbf16>
    %6 = vector.shape_cast %5 : vector<1x144x96xbf16> to vector<144x96xbf16>
    %cst_7 = arith.constant dense<0.000000e+00> : vector<48x96xf32>
    %7 = tpu.matmul %4, %6, %cst_7 {dimension_numbers = #tpu.dot_dimension_numbers<[1], [0], [0], [1], [0, 0, 1, 1], [], []>} : vector<48x144xbf16>, vector<144x96xbf16>, vector<48x96xf32> -> vector<48x96xf32>
    %c1 = arith.constant 1 : index
    %c0_8 = arith.constant 0 : index
    %c0_9 = arith.constant 0 : index
    %8 = vector.load %arg1[%c1, %c0_8, %c0_9] : memref<4x48x96xbf16, #tpu.memory_space<vmem>>, vector<1x48x96xbf16>
    %9 = vector.shape_cast %8 : vector<1x48x96xbf16> to vector<48x96xbf16>
    %cst_10 = arith.constant dense<0.000000e+00> : vector<48x144xf32>
    %10 = tpu.matmul %9, %0, %cst_10 {dimension_numbers = #tpu.dot_dimension_numbers<[1], [0], [0], [1], [0, 0, 1, 1], [], []>} : vector<48x96xbf16>, vector<96x144xbf16>, vector<48x144xf32> -> vector<48x144xf32>
    %11 = arith.truncf %10 : vector<48x144xf32> to vector<48x144xbf16>
    %c1_11 = arith.constant 1 : index
    %c0_12 = arith.constant 0 : index
    %c0_13 = arith.constant 0 : index
    %12 = vector.load %arg2[%c1_11, %c0_12, %c0_13] : memref<4x144x96xbf16, #tpu.memory_space<vmem>>, vector<1x144x96xbf16>
    %13 = vector.shape_cast %12 : vector<1x144x96xbf16> to vector<144x96xbf16>
    %cst_14 = arith.constant dense<0.000000e+00> : vector<48x96xf32>
    %14 = tpu.matmul %11, %13, %cst_14 {dimension_numbers = #tpu.dot_dimension_numbers<[1], [0], [0], [1], [0, 0, 1, 1], [], []>} : vector<48x144xbf16>, vector<144x96xbf16>, vector<48x96xf32> -> vector<48x96xf32>
    %15 = arith.addf %7, %14 : vector<48x96xf32>
    %c2 = arith.constant 2 : index
    %c0_15 = arith.constant 0 : index
    %c0_16 = arith.constant 0 : index
    %16 = vector.load %arg1[%c2, %c0_15, %c0_16] : memref<4x48x96xbf16, #tpu.memory_space<vmem>>, vector<1x48x96xbf16>
    %17 = vector.shape_cast %16 : vector<1x48x96xbf16> to vector<48x96xbf16>
    %cst_17 = arith.constant dense<0.000000e+00> : vector<48x144xf32>
    %18 = tpu.matmul %17, %0, %cst_17 {dimension_numbers = #tpu.dot_dimension_numbers<[1], [0], [0], [1], [0, 0, 1, 1], [], []>} : vector<48x96xbf16>, vector<96x144xbf16>, vector<48x144xf32> -> vector<48x144xf32>
    %19 = arith.truncf %18 : vector<48x144xf32> to vector<48x144xbf16>
    %c2_18 = arith.constant 2 : index
    %c0_19 = arith.constant 0 : index
    %c0_20 = arith.constant 0 : index
    %20 = vector.load %arg2[%c2_18, %c0_19, %c0_20] : memref<4x144x96xbf16, #tpu.memory_space<vmem>>, vector<1x144x96xbf16>
    %21 = vector.shape_cast %20 : vector<1x144x96xbf16> to vector<144x96xbf16>
    %cst_21 = arith.constant dense<0.000000e+00> : vector<48x96xf32>
    %22 = tpu.matmul %19, %21, %cst_21 {dimension_numbers = #tpu.dot_dimension_numbers<[1], [0], [0], [1], [0, 0, 1, 1], [], []>} : vector<48x144xbf16>, vector<144x96xbf16>, vector<48x96xf32> -> vector<48x96xf32>
    %23 = arith.addf %15, %22 : vector<48x96xf32>
    %c3 = arith.constant 3 : index
    %c0_22 = arith.constant 0 : index
    %c0_23 = arith.constant 0 : index
    %24 = vector.load %arg1[%c3, %c0_22, %c0_23] : memref<4x48x96xbf16, #tpu.memory_space<vmem>>, vector<1x48x96xbf16>
    %25 = vector.shape_cast %24 : vector<1x48x96xbf16> to vector<48x96xbf16>
    %cst_24 = arith.constant dense<0.000000e+00> : vector<48x144xf32>
    %26 = tpu.matmul %25, %0, %cst_24 {dimension_numbers = #tpu.dot_dimension_numbers<[1], [0], [0], [1], [0, 0, 1, 1], [], []>} : vector<48x96xbf16>, vector<96x144xbf16>, vector<48x144xf32> -> vector<48x144xf32>
    %27 = arith.truncf %26 : vector<48x144xf32> to vector<48x144xbf16>
    %c3_25 = arith.constant 3 : index
    %c0_26 = arith.constant 0 : index
    %c0_27 = arith.constant 0 : index
    %28 = vector.load %arg2[%c3_25, %c0_26, %c0_27] : memref<4x144x96xbf16, #tpu.memory_space<vmem>>, vector<1x144x96xbf16>
    %29 = vector.shape_cast %28 : vector<1x144x96xbf16> to vector<144x96xbf16>
    %cst_28 = arith.constant dense<0.000000e+00> : vector<48x96xf32>
    %30 = tpu.matmul %27, %29, %cst_28 {dimension_numbers = #tpu.dot_dimension_numbers<[1], [0], [0], [1], [0, 0, 1, 1], [], []>} : vector<48x144xbf16>, vector<144x96xbf16>, vector<48x96xf32> -> vector<48x96xf32>
    %31 = arith.addf %23, %30 : vector<48x96xf32>
    %c0_29 = arith.constant 0 : index
    %c0_30 = arith.constant 0 : index
    %32 = vector.load %arg3[%c0_29, %c0_30] : memref<1x96xf32, #tpu.memory_space<vmem>>, vector<1x96xf32>
    %33 = vector.broadcast %32 : vector<1x96xf32> to vector<48x96xf32>
    %34 = arith.addf %31, %33 : vector<48x96xf32>
    %cst_31 = arith.constant 0.000000e+00 : f32
    %35 = vector.broadcast %cst_31 : f32 to vector<48x96xf32>
    %36 = arith.cmpf oge, %34, %35 : vector<48x96xf32>
    %cst_32 = arith.constant 2.000000e-01 : f32
    %37 = vector.broadcast %cst_32 : f32 to vector<48x96xf32>
    %38 = arith.mulf %37, %34 : vector<48x96xf32>
    %39 = arith.select %36, %34, %38 : vector<48x96xi1>, vector<48x96xf32>
    %40 = arith.truncf %39 : vector<48x96xf32> to vector<48x96xbf16>
    %c0_33 = arith.constant 0 : index
    %c0_34 = arith.constant 0 : index
    %c0_35 = arith.constant 0 : index
    %41 = vector.load %arg4[%c0_33, %c0_34, %c0_35] : memref<4x24x48xbf16, #tpu.memory_space<vmem>>, vector<1x24x48xbf16>
    %42 = vector.shape_cast %41 : vector<1x24x48xbf16> to vector<24x48xbf16>
    %cst_36 = arith.constant dense<0.000000e+00> : vector<24x96xf32>
    %43 = tpu.matmul %42, %40, %cst_36 {dimension_numbers = #tpu.dot_dimension_numbers<[1], [0], [0], [1], [0, 0, 1, 1], [], []>} : vector<24x48xbf16>, vector<48x96xbf16>, vector<24x96xf32> -> vector<24x96xf32>
    %44 = arith.truncf %43 : vector<24x96xf32> to vector<24x96xbf16>
    %c0_37 = arith.constant 0 : index
    %c0_38 = arith.constant 0 : index
    %c0_39 = arith.constant 0 : index
    %45 = vector.load %arg5[%c0_37, %c0_38, %c0_39] : memref<4x96x96xbf16, #tpu.memory_space<vmem>>, vector<1x96x96xbf16>
    %46 = vector.shape_cast %45 : vector<1x96x96xbf16> to vector<96x96xbf16>
    %cst_40 = arith.constant dense<0.000000e+00> : vector<24x96xf32>
    %47 = tpu.matmul %44, %46, %cst_40 {dimension_numbers = #tpu.dot_dimension_numbers<[1], [0], [0], [1], [0, 0, 1, 1], [], []>} : vector<24x96xbf16>, vector<96x96xbf16>, vector<24x96xf32> -> vector<24x96xf32>
    %c1_41 = arith.constant 1 : index
    %c0_42 = arith.constant 0 : index
    %c0_43 = arith.constant 0 : index
    %48 = vector.load %arg4[%c1_41, %c0_42, %c0_43] : memref<4x24x48xbf16, #tpu.memory_space<vmem>>, vector<1x24x48xbf16>
    %49 = vector.shape_cast %48 : vector<1x24x48xbf16> to vector<24x48xbf16>
    %cst_44 = arith.constant dense<0.000000e+00> : vector<24x96xf32>
    %50 = tpu.matmul %49, %40, %cst_44 {dimension_numbers = #tpu.dot_dimension_numbers<[1], [0], [0], [1], [0, 0, 1, 1], [], []>} : vector<24x48xbf16>, vector<48x96xbf16>, vector<24x96xf32> -> vector<24x96xf32>
    %51 = arith.truncf %50 : vector<24x96xf32> to vector<24x96xbf16>
    %c1_45 = arith.constant 1 : index
    %c0_46 = arith.constant 0 : index
    %c0_47 = arith.constant 0 : index
    %52 = vector.load %arg5[%c1_45, %c0_46, %c0_47] : memref<4x96x96xbf16, #tpu.memory_space<vmem>>, vector<1x96x96xbf16>
    %53 = vector.shape_cast %52 : vector<1x96x96xbf16> to vector<96x96xbf16>
    %cst_48 = arith.constant dense<0.000000e+00> : vector<24x96xf32>
    %54 = tpu.matmul %51, %53, %cst_48 {dimension_numbers = #tpu.dot_dimension_numbers<[1], [0], [0], [1], [0, 0, 1, 1], [], []>} : vector<24x96xbf16>, vector<96x96xbf16>, vector<24x96xf32> -> vector<24x96xf32>
    %55 = arith.addf %47, %54 : vector<24x96xf32>
    %c2_49 = arith.constant 2 : index
    %c0_50 = arith.constant 0 : index
    %c0_51 = arith.constant 0 : index
    %56 = vector.load %arg4[%c2_49, %c0_50, %c0_51] : memref<4x24x48xbf16, #tpu.memory_space<vmem>>, vector<1x24x48xbf16>
    %57 = vector.shape_cast %56 : vector<1x24x48xbf16> to vector<24x48xbf16>
    %cst_52 = arith.constant dense<0.000000e+00> : vector<24x96xf32>
    %58 = tpu.matmul %57, %40, %cst_52 {dimension_numbers = #tpu.dot_dimension_numbers<[1], [0], [0], [1], [0, 0, 1, 1], [], []>} : vector<24x48xbf16>, vector<48x96xbf16>, vector<24x96xf32> -> vector<24x96xf32>
    %59 = arith.truncf %58 : vector<24x96xf32> to vector<24x96xbf16>
    %c2_53 = arith.constant 2 : index
    %c0_54 = arith.constant 0 : index
    %c0_55 = arith.constant 0 : index
    %60 = vector.load %arg5[%c2_53, %c0_54, %c0_55] : memref<4x96x96xbf16, #tpu.memory_space<vmem>>, vector<1x96x96xbf16>
    %61 = vector.shape_cast %60 : vector<1x96x96xbf16> to vector<96x96xbf16>
    %cst_56 = arith.constant dense<0.000000e+00> : vector<24x96xf32>
    %62 = tpu.matmul %59, %61, %cst_56 {dimension_numbers = #tpu.dot_dimension_numbers<[1], [0], [0], [1], [0, 0, 1, 1], [], []>} : vector<24x96xbf16>, vector<96x96xbf16>, vector<24x96xf32> -> vector<24x96xf32>
    %63 = arith.addf %55, %62 : vector<24x96xf32>
    %c3_57 = arith.constant 3 : index
    %c0_58 = arith.constant 0 : index
    %c0_59 = arith.constant 0 : index
    %64 = vector.load %arg4[%c3_57, %c0_58, %c0_59] : memref<4x24x48xbf16, #tpu.memory_space<vmem>>, vector<1x24x48xbf16>
    %65 = vector.shape_cast %64 : vector<1x24x48xbf16> to vector<24x48xbf16>
    %cst_60 = arith.constant dense<0.000000e+00> : vector<24x96xf32>
    %66 = tpu.matmul %65, %40, %cst_60 {dimension_numbers = #tpu.dot_dimension_numbers<[1], [0], [0], [1], [0, 0, 1, 1], [], []>} : vector<24x48xbf16>, vector<48x96xbf16>, vector<24x96xf32> -> vector<24x96xf32>
    %67 = arith.truncf %66 : vector<24x96xf32> to vector<24x96xbf16>
    %c3_61 = arith.constant 3 : index
    %c0_62 = arith.constant 0 : index
    %c0_63 = arith.constant 0 : index
    %68 = vector.load %arg5[%c3_61, %c0_62, %c0_63] : memref<4x96x96xbf16, #tpu.memory_space<vmem>>, vector<1x96x96xbf16>
    %69 = vector.shape_cast %68 : vector<1x96x96xbf16> to vector<96x96xbf16>
    %cst_64 = arith.constant dense<0.000000e+00> : vector<24x96xf32>
    %70 = tpu.matmul %67, %69, %cst_64 {dimension_numbers = #tpu.dot_dimension_numbers<[1], [0], [0], [1], [0, 0, 1, 1], [], []>} : vector<24x96xbf16>, vector<96x96xbf16>, vector<24x96xf32> -> vector<24x96xf32>
    %71 = arith.addf %63, %70 : vector<24x96xf32>
    %c0_65 = arith.constant 0 : index
    %c0_66 = arith.constant 0 : index
    %72 = vector.load %arg6[%c0_65, %c0_66] : memref<1x96xf32, #tpu.memory_space<vmem>>, vector<1x96xf32>
    %73 = vector.broadcast %72 : vector<1x96xf32> to vector<24x96xf32>
    %74 = arith.addf %71, %73 : vector<24x96xf32>
    %cst_67 = arith.constant 0.000000e+00 : f32
    %75 = vector.broadcast %cst_67 : f32 to vector<24x96xf32>
    %76 = arith.cmpf oge, %74, %75 : vector<24x96xf32>
    %cst_68 = arith.constant 2.000000e-01 : f32
    %77 = vector.broadcast %cst_68 : f32 to vector<24x96xf32>
    %78 = arith.mulf %77, %74 : vector<24x96xf32>
    %79 = arith.select %76, %74, %78 : vector<24x96xi1>, vector<24x96xf32>
    %80 = arith.truncf %79 : vector<24x96xf32> to vector<24x96xbf16>
    %c0_69 = arith.constant 0 : index
    %c0_70 = arith.constant 0 : index
    %c0_71 = arith.constant 0 : index
    %81 = vector.load %arg7[%c0_69, %c0_70, %c0_71] : memref<4x12x24xbf16, #tpu.memory_space<vmem>>, vector<1x12x24xbf16>
    %82 = vector.shape_cast %81 : vector<1x12x24xbf16> to vector<12x24xbf16>
    %cst_72 = arith.constant dense<0.000000e+00> : vector<12x96xf32>
    %83 = tpu.matmul %82, %80, %cst_72 {dimension_numbers = #tpu.dot_dimension_numbers<[1], [0], [0], [1], [0, 0, 1, 1], [], []>} : vector<12x24xbf16>, vector<24x96xbf16>, vector<12x96xf32> -> vector<12x96xf32>
    %84 = arith.truncf %83 : vector<12x96xf32> to vector<12x96xbf16>
    %c0_73 = arith.constant 0 : index
    %c0_74 = arith.constant 0 : index
    %c0_75 = arith.constant 0 : index
    %85 = vector.load %arg8[%c0_73, %c0_74, %c0_75] : memref<4x96x96xbf16, #tpu.memory_space<vmem>>, vector<1x96x96xbf16>
    %86 = vector.shape_cast %85 : vector<1x96x96xbf16> to vector<96x96xbf16>
    %cst_76 = arith.constant dense<0.000000e+00> : vector<12x96xf32>
    %87 = tpu.matmul %84, %86, %cst_76 {dimension_numbers = #tpu.dot_dimension_numbers<[1], [0], [0], [1], [0, 0, 1, 1], [], []>} : vector<12x96xbf16>, vector<96x96xbf16>, vector<12x96xf32> -> vector<12x96xf32>
    %c1_77 = arith.constant 1 : index
    %c0_78 = arith.constant 0 : index
    %c0_79 = arith.constant 0 : index
    %88 = vector.load %arg7[%c1_77, %c0_78, %c0_79] : memref<4x12x24xbf16, #tpu.memory_space<vmem>>, vector<1x12x24xbf16>
    %89 = vector.shape_cast %88 : vector<1x12x24xbf16> to vector<12x24xbf16>
    %cst_80 = arith.constant dense<0.000000e+00> : vector<12x96xf32>
    %90 = tpu.matmul %89, %80, %cst_80 {dimension_numbers = #tpu.dot_dimension_numbers<[1], [0], [0], [1], [0, 0, 1, 1], [], []>} : vector<12x24xbf16>, vector<24x96xbf16>, vector<12x96xf32> -> vector<12x96xf32>
    %91 = arith.truncf %90 : vector<12x96xf32> to vector<12x96xbf16>
    %c1_81 = arith.constant 1 : index
    %c0_82 = arith.constant 0 : index
    %c0_83 = arith.constant 0 : index
    %92 = vector.load %arg8[%c1_81, %c0_82, %c0_83] : memref<4x96x96xbf16, #tpu.memory_space<vmem>>, vector<1x96x96xbf16>
    %93 = vector.shape_cast %92 : vector<1x96x96xbf16> to vector<96x96xbf16>
    %cst_84 = arith.constant dense<0.000000e+00> : vector<12x96xf32>
    %94 = tpu.matmul %91, %93, %cst_84 {dimension_numbers = #tpu.dot_dimension_numbers<[1], [0], [0], [1], [0, 0, 1, 1], [], []>} : vector<12x96xbf16>, vector<96x96xbf16>, vector<12x96xf32> -> vector<12x96xf32>
    %95 = arith.addf %87, %94 : vector<12x96xf32>
    %c2_85 = arith.constant 2 : index
    %c0_86 = arith.constant 0 : index
    %c0_87 = arith.constant 0 : index
    %96 = vector.load %arg7[%c2_85, %c0_86, %c0_87] : memref<4x12x24xbf16, #tpu.memory_space<vmem>>, vector<1x12x24xbf16>
    %97 = vector.shape_cast %96 : vector<1x12x24xbf16> to vector<12x24xbf16>
    %cst_88 = arith.constant dense<0.000000e+00> : vector<12x96xf32>
    %98 = tpu.matmul %97, %80, %cst_88 {dimension_numbers = #tpu.dot_dimension_numbers<[1], [0], [0], [1], [0, 0, 1, 1], [], []>} : vector<12x24xbf16>, vector<24x96xbf16>, vector<12x96xf32> -> vector<12x96xf32>
    %99 = arith.truncf %98 : vector<12x96xf32> to vector<12x96xbf16>
    %c2_89 = arith.constant 2 : index
    %c0_90 = arith.constant 0 : index
    %c0_91 = arith.constant 0 : index
    %100 = vector.load %arg8[%c2_89, %c0_90, %c0_91] : memref<4x96x96xbf16, #tpu.memory_space<vmem>>, vector<1x96x96xbf16>
    %101 = vector.shape_cast %100 : vector<1x96x96xbf16> to vector<96x96xbf16>
    %cst_92 = arith.constant dense<0.000000e+00> : vector<12x96xf32>
    %102 = tpu.matmul %99, %101, %cst_92 {dimension_numbers = #tpu.dot_dimension_numbers<[1], [0], [0], [1], [0, 0, 1, 1], [], []>} : vector<12x96xbf16>, vector<96x96xbf16>, vector<12x96xf32> -> vector<12x96xf32>
    %103 = arith.addf %95, %102 : vector<12x96xf32>
    %c3_93 = arith.constant 3 : index
    %c0_94 = arith.constant 0 : index
    %c0_95 = arith.constant 0 : index
    %104 = vector.load %arg7[%c3_93, %c0_94, %c0_95] : memref<4x12x24xbf16, #tpu.memory_space<vmem>>, vector<1x12x24xbf16>
    %105 = vector.shape_cast %104 : vector<1x12x24xbf16> to vector<12x24xbf16>
    %cst_96 = arith.constant dense<0.000000e+00> : vector<12x96xf32>
    %106 = tpu.matmul %105, %80, %cst_96 {dimension_numbers = #tpu.dot_dimension_numbers<[1], [0], [0], [1], [0, 0, 1, 1], [], []>} : vector<12x24xbf16>, vector<24x96xbf16>, vector<12x96xf32> -> vector<12x96xf32>
    %107 = arith.truncf %106 : vector<12x96xf32> to vector<12x96xbf16>
    %c3_97 = arith.constant 3 : index
    %c0_98 = arith.constant 0 : index
    %c0_99 = arith.constant 0 : index
    %108 = vector.load %arg8[%c3_97, %c0_98, %c0_99] : memref<4x96x96xbf16, #tpu.memory_space<vmem>>, vector<1x96x96xbf16>
    %109 = vector.shape_cast %108 : vector<1x96x96xbf16> to vector<96x96xbf16>
    %cst_100 = arith.constant dense<0.000000e+00> : vector<12x96xf32>
    %110 = tpu.matmul %107, %109, %cst_100 {dimension_numbers = #tpu.dot_dimension_numbers<[1], [0], [0], [1], [0, 0, 1, 1], [], []>} : vector<12x96xbf16>, vector<96x96xbf16>, vector<12x96xf32> -> vector<12x96xf32>
    %111 = arith.addf %103, %110 : vector<12x96xf32>
    %c0_101 = arith.constant 0 : index
    %c0_102 = arith.constant 0 : index
    %112 = vector.load %arg9[%c0_101, %c0_102] : memref<1x96xf32, #tpu.memory_space<vmem>>, vector<1x96xf32>
    %113 = vector.broadcast %112 : vector<1x96xf32> to vector<12x96xf32>
    %114 = arith.addf %111, %113 : vector<12x96xf32>
    %cst_103 = arith.constant 0.000000e+00 : f32
    %115 = vector.broadcast %cst_103 : f32 to vector<12x96xf32>
    %116 = arith.cmpf oge, %114, %115 : vector<12x96xf32>
    %cst_104 = arith.constant 2.000000e-01 : f32
    %117 = vector.broadcast %cst_104 : f32 to vector<12x96xf32>
    %118 = arith.mulf %117, %114 : vector<12x96xf32>
    %119 = arith.select %116, %114, %118 : vector<12x96xi1>, vector<12x96xf32>
    %120 = arith.truncf %119 : vector<12x96xf32> to vector<12x96xbf16>
    %c0_105 = arith.constant 0 : index
    %c0_106 = arith.constant 0 : index
    %c0_107 = arith.constant 0 : index
    %121 = vector.load %arg10[%c0_105, %c0_106, %c0_107] : memref<4x6x12xbf16, #tpu.memory_space<vmem>>, vector<1x6x12xbf16>
    %122 = vector.shape_cast %121 : vector<1x6x12xbf16> to vector<6x12xbf16>
    %cst_108 = arith.constant dense<0.000000e+00> : vector<6x96xf32>
    %123 = tpu.matmul %122, %120, %cst_108 {dimension_numbers = #tpu.dot_dimension_numbers<[1], [0], [0], [1], [0, 0, 1, 1], [], []>} : vector<6x12xbf16>, vector<12x96xbf16>, vector<6x96xf32> -> vector<6x96xf32>
    %124 = arith.truncf %123 : vector<6x96xf32> to vector<6x96xbf16>
    %c0_109 = arith.constant 0 : index
    %c0_110 = arith.constant 0 : index
    %c0_111 = arith.constant 0 : index
    %125 = vector.load %arg11[%c0_109, %c0_110, %c0_111] : memref<4x96x96xbf16, #tpu.memory_space<vmem>>, vector<1x96x96xbf16>
    %126 = vector.shape_cast %125 : vector<1x96x96xbf16> to vector<96x96xbf16>
    %cst_112 = arith.constant dense<0.000000e+00> : vector<6x96xf32>
    %127 = tpu.matmul %124, %126, %cst_112 {dimension_numbers = #tpu.dot_dimension_numbers<[1], [0], [0], [1], [0, 0, 1, 1], [], []>} : vector<6x96xbf16>, vector<96x96xbf16>, vector<6x96xf32> -> vector<6x96xf32>
    %c1_113 = arith.constant 1 : index
    %c0_114 = arith.constant 0 : index
    %c0_115 = arith.constant 0 : index
    %128 = vector.load %arg10[%c1_113, %c0_114, %c0_115] : memref<4x6x12xbf16, #tpu.memory_space<vmem>>, vector<1x6x12xbf16>
    %129 = vector.shape_cast %128 : vector<1x6x12xbf16> to vector<6x12xbf16>
    %cst_116 = arith.constant dense<0.000000e+00> : vector<6x96xf32>
    %130 = tpu.matmul %129, %120, %cst_116 {dimension_numbers = #tpu.dot_dimension_numbers<[1], [0], [0], [1], [0, 0, 1, 1], [], []>} : vector<6x12xbf16>, vector<12x96xbf16>, vector<6x96xf32> -> vector<6x96xf32>
    %131 = arith.truncf %130 : vector<6x96xf32> to vector<6x96xbf16>
    %c1_117 = arith.constant 1 : index
    %c0_118 = arith.constant 0 : index
    %c0_119 = arith.constant 0 : index
    %132 = vector.load %arg11[%c1_117, %c0_118, %c0_119] : memref<4x96x96xbf16, #tpu.memory_space<vmem>>, vector<1x96x96xbf16>
    %133 = vector.shape_cast %132 : vector<1x96x96xbf16> to vector<96x96xbf16>
    %cst_120 = arith.constant dense<0.000000e+00> : vector<6x96xf32>
    %134 = tpu.matmul %131, %133, %cst_120 {dimension_numbers = #tpu.dot_dimension_numbers<[1], [0], [0], [1], [0, 0, 1, 1], [], []>} : vector<6x96xbf16>, vector<96x96xbf16>, vector<6x96xf32> -> vector<6x96xf32>
    %135 = arith.addf %127, %134 : vector<6x96xf32>
    %c2_121 = arith.constant 2 : index
    %c0_122 = arith.constant 0 : index
    %c0_123 = arith.constant 0 : index
    %136 = vector.load %arg10[%c2_121, %c0_122, %c0_123] : memref<4x6x12xbf16, #tpu.memory_space<vmem>>, vector<1x6x12xbf16>
    %137 = vector.shape_cast %136 : vector<1x6x12xbf16> to vector<6x12xbf16>
    %cst_124 = arith.constant dense<0.000000e+00> : vector<6x96xf32>
    %138 = tpu.matmul %137, %120, %cst_124 {dimension_numbers = #tpu.dot_dimension_numbers<[1], [0], [0], [1], [0, 0, 1, 1], [], []>} : vector<6x12xbf16>, vector<12x96xbf16>, vector<6x96xf32> -> vector<6x96xf32>
    %139 = arith.truncf %138 : vector<6x96xf32> to vector<6x96xbf16>
    %c2_125 = arith.constant 2 : index
    %c0_126 = arith.constant 0 : index
    %c0_127 = arith.constant 0 : index
    %140 = vector.load %arg11[%c2_125, %c0_126, %c0_127] : memref<4x96x96xbf16, #tpu.memory_space<vmem>>, vector<1x96x96xbf16>
    %141 = vector.shape_cast %140 : vector<1x96x96xbf16> to vector<96x96xbf16>
    %cst_128 = arith.constant dense<0.000000e+00> : vector<6x96xf32>
    %142 = tpu.matmul %139, %141, %cst_128 {dimension_numbers = #tpu.dot_dimension_numbers<[1], [0], [0], [1], [0, 0, 1, 1], [], []>} : vector<6x96xbf16>, vector<96x96xbf16>, vector<6x96xf32> -> vector<6x96xf32>
    %143 = arith.addf %135, %142 : vector<6x96xf32>
    %c3_129 = arith.constant 3 : index
    %c0_130 = arith.constant 0 : index
    %c0_131 = arith.constant 0 : index
    %144 = vector.load %arg10[%c3_129, %c0_130, %c0_131] : memref<4x6x12xbf16, #tpu.memory_space<vmem>>, vector<1x6x12xbf16>
    %145 = vector.shape_cast %144 : vector<1x6x12xbf16> to vector<6x12xbf16>
    %cst_132 = arith.constant dense<0.000000e+00> : vector<6x96xf32>
    %146 = tpu.matmul %145, %120, %cst_132 {dimension_numbers = #tpu.dot_dimension_numbers<[1], [0], [0], [1], [0, 0, 1, 1], [], []>} : vector<6x12xbf16>, vector<12x96xbf16>, vector<6x96xf32> -> vector<6x96xf32>
    %147 = arith.truncf %146 : vector<6x96xf32> to vector<6x96xbf16>
    %c3_133 = arith.constant 3 : index
    %c0_134 = arith.constant 0 : index
    %c0_135 = arith.constant 0 : index
    %148 = vector.load %arg11[%c3_133, %c0_134, %c0_135] : memref<4x96x96xbf16, #tpu.memory_space<vmem>>, vector<1x96x96xbf16>
    %149 = vector.shape_cast %148 : vector<1x96x96xbf16> to vector<96x96xbf16>
    %cst_136 = arith.constant dense<0.000000e+00> : vector<6x96xf32>
    %150 = tpu.matmul %147, %149, %cst_136 {dimension_numbers = #tpu.dot_dimension_numbers<[1], [0], [0], [1], [0, 0, 1, 1], [], []>} : vector<6x96xbf16>, vector<96x96xbf16>, vector<6x96xf32> -> vector<6x96xf32>
    %151 = arith.addf %143, %150 : vector<6x96xf32>
    %c0_137 = arith.constant 0 : index
    %c0_138 = arith.constant 0 : index
    %152 = vector.load %arg12[%c0_137, %c0_138] : memref<1x96xf32, #tpu.memory_space<vmem>>, vector<1x96xf32>
    %153 = vector.broadcast %152 : vector<1x96xf32> to vector<6x96xf32>
    %154 = arith.addf %151, %153 : vector<6x96xf32>
    %cst_139 = arith.constant 0.000000e+00 : f32
    %155 = vector.broadcast %cst_139 : f32 to vector<6x96xf32>
    %156 = arith.cmpf oge, %154, %155 : vector<6x96xf32>
    %cst_140 = arith.constant 2.000000e-01 : f32
    %157 = vector.broadcast %cst_140 : f32 to vector<6x96xf32>
    %158 = arith.mulf %157, %154 : vector<6x96xf32>
    %159 = arith.select %156, %154, %158 : vector<6x96xi1>, vector<6x96xf32>
    %160 = arith.truncf %159 : vector<6x96xf32> to vector<6x96xbf16>
    %161 = arith.extf %160 : vector<6x96xbf16> to vector<6x96xf32>
    %c0_141 = arith.constant 0 : index
    %c0_142 = arith.constant 0 : index
    %162 = vector.load %arg13[%c0_141, %c0_142] : memref<6x96xf32, #tpu.memory_space<vmem>>, vector<6x96xf32>
    %163 = arith.mulf %161, %162 : vector<6x96xf32>
    %c0_143 = arith.constant 0 : index
    %c0_144 = arith.constant 0 : index
    %164 = vector.load %arg14[%c0_143, %c0_144] : memref<2x6xf32, #tpu.memory_space<vmem>>, vector<2x6xf32>
    %cst_145 = arith.constant dense<0.000000e+00> : vector<2x96xf32>
    %165 = tpu.matmul %164, %163, %cst_145 {dimension_numbers = #tpu.dot_dimension_numbers<[1], [0], [0], [1], [0, 0, 1, 1], [], []>} : vector<2x6xf32>, vector<6x96xf32>, vector<2x96xf32> -> vector<2x96xf32>
    %cst_146 = arith.constant dense<0.000000e+00> : vector<2xf32>
    %166 = vector.multi_reduction <add>, %165, %cst_146 [1] : vector<2x96xf32> to vector<2xf32>
    %167 = vector.shape_cast %166 : vector<2xf32> to vector<2x1xf32>
    %c0_147 = arith.constant 0 : index
    %c0_148 = arith.constant 0 : index
    %168 = vector.load %arg15[%c0_147, %c0_148] : memref<2x1xf32, #tpu.memory_space<vmem>>, vector<2x1xf32>
    tpu.vector_store %arg15[%c0_147, %c0_148], %167 {strides = array<i32>} : memref<2x1xf32, #tpu.memory_space<vmem>>, vector<2x1xf32>,
    return
  }
}

</mosaic_0001>

<bundles_post_ra>
// kernel: discriminator_forward.1
= control target key start
LH: loop header
LB: loop body
LE: loop exit
PB: predicated region body
PF: predicated region fallthrough
CT: control target
= control target key end

     0   :  { %vm144_vm0 = vcmask 785408   ;;  %vm384_vm1 = vcmask 130048   ;;  %vm1037_vm8 = vcmask 392192   ;;  %vm1504_vm12 = vcmask 1043456   ;;  %s4027_s0 = inlined_call_operand.vmem [shape: bf16[96,144], index: 0, kind: input, shape index: {}]   ;;  %s4028_s1 = inlined_call_operand.vmem [shape: bf16[4,48,96], index: 1, kind: input, shape index: {}]   ;;  %s4029_s2 = inlined_call_operand.vmem [shape: bf16[4,144,96], index: 2, kind: input, shape index: {}]   ;;  %s4030_s3 = inlined_call_operand.vmem [shape: f32[1,96], index: 3, kind: input, shape index: {}]   ;;  %s4031_s5 = inlined_call_operand.vmem [shape: bf16[4,96,96], index: 5, kind: input, shape index: {}]   ;;  %s4032_s4 = inlined_call_operand.vmem [shape: bf16[4,24,48], index: 4, kind: input, shape index: {}]   ;;  %s4033_s6 = inlined_call_operand.vmem [shape: f32[1,96], index: 6, kind: input, shape index: {}]   ;;  %s4034_s8 = inlined_call_operand.vmem [shape: bf16[4,96,96], index: 8, kind: input, shape index: {}]   ;;  %s4035_s7 = inlined_call_operand.vmem [shape: bf16[4,12,24], index: 7, kind: input, shape index: {}]   ;;  %s4036_s9 = inlined_call_operand.vmem [shape: f32[1,96], index: 9, kind: input, shape index: {}]   ;;  %s4037_s10 = inlined_call_operand.vmem [shape: bf16[4,6,12], index: 10, kind: input, shape index: {}]   ;;  %s4038_s11 = inlined_call_operand.vmem [shape: bf16[4,96,96], index: 11, kind: input, shape index: {}]   ;;  %s4039_s12 = inlined_call_operand.vmem [shape: f32[1,96], index: 12, kind: input, shape index: {}]   ;;  %s4040_s13 = inlined_call_operand.vmem [shape: f32[6,96], index: 13, kind: input, shape index: {}]   ;;  %s4041_s14 = inlined_call_operand.vmem [shape: f32[2,6], index: 14, kind: input, shape index: {}]   ;;  %s4042_s15 = inlined_call_operand.vmem [shape: f32[2,1], index: 15, kind: output, shape index: {}]  }
   0x1   :  { %v2326_v0 = vld [vmem:[%s4027_s0 + $0x50] sm:$0xf]  ;;  %v3111_v1 = vld [vmem:[%s4027_s0 + $0x54] sm:$0xf0]  ;;  %v3110_v2 = vld [vmem:[%s4027_s0 + $0x54] sm:$0xf] }
   0x2   :  { %v3333_v3 = vor.u32 %v3111_v1, %v2326_v0  ;;  %v2328_v4 = vld [vmem:[%s4027_s0 + $0x58] sm:$0xf0]  ;;  %v2318_v5 = vld [vmem:[%s4027_s0 + $0x40] sm:$0xf]  ;;  %v3109_v6 = vld [vmem:[%s4027_s0 + $0x44] sm:$0xf0] }
   0x3   :  { %v3344_v7 = vor.u32 %v3110_v2, %v2328_v4  ;;  %v3108_v8 = vld [vmem:[%s4027_s0 + $0x44] sm:$0xf]  ;;  %v2320_v9 = vld [vmem:[%s4027_s0 + $0x48] sm:$0xf0]  ;;  %v3354_v10 = vor.u32 %v3109_v6, %v2318_v5  ;;  %v2310_v12 = vld [vmem:[%s4027_s0 + $0x30] sm:$0xf] }
   0x4   :  { %259 = vmatpush.bf16.msra.mxu2 %v3333_v3  ;;  %156 = vmatpush.bf16.msra.mxu0 %v3333_v3  ;;  %v3358_v11 = vor.u32 %v3108_v8, %v2320_v9  ;;  %v3107_v13 = vld [vmem:[%s4027_s0 + $0x34] sm:$0xf0]  ;;  %v3106_v14 = vld [vmem:[%s4027_s0 + $0x34] sm:$0xf]  ;;  %v2312_v15 = vld [vmem:[%s4027_s0 + $0x38] sm:$0xf0] }
   0x5   :  { %283 = vmatpush.bf16.msra.mxu3 %v3344_v7  ;;  %180 = vmatpush.bf16.msra.mxu1 %v3344_v7  ;;  %v3374_v16 = vor.u32 %v3107_v13, %v2310_v12  ;;  %v3378_v17 = vor.u32 %v3106_v14, %v2312_v15  ;;  %v2302_v18 = vld [vmem:[%s4027_s0 + $0x20] sm:$0xf]  ;;  %v3105_v19 = vld [vmem:[%s4027_s0 + $0x24] sm:$0xf0]  ;;  %v3104_v20 = vld [vmem:[%s4027_s0 + $0x24] sm:$0xf] }
   0x6   :  { %v2304_v21 = vld [vmem:[%s4027_s0 + $0x28] sm:$0xf0]  ;;  %v3394_v22 = vor.u32 %v3105_v19, %v2302_v18  ;;  %v2294_v24 = vld [vmem:[%s4027_s0 + $0x10] sm:$0xf]  ;;  %v3103_v25 = vld [vmem:[%s4027_s0 + $0x14] sm:$0xf0] }
   0x7   :  { %v3398_v23 = vor.u32 %v3104_v20, %v2304_v21  ;;  %v3102_v26 = vld [vmem:[%s4027_s0 + $0x14] sm:$0xf]  ;;  %v2296_v27 = vld [vmem:[%s4027_s0 + $0x18] sm:$0xf0]  ;;  %v3414_v28 = vor.u32 %v3103_v25, %v2294_v24  ;;  %v2286_v30 = vld [vmem:[%s4027_s0] sm:$0xf] }
   0x8   :  { %260 = vmatpush.bf16.msra.mxu2 %v3354_v10  ;;  %157 = vmatpush.bf16.msra.mxu0 %v3354_v10  ;;  %v3418_v29 = vor.u32 %v3102_v26, %v2296_v27  ;;  %v3101_v31 = vld [vmem:[%s4027_s0 + $0x4] sm:$0xf0]  ;;  %v3100_v32 = vld [vmem:[%s4027_s0 + $0x4] sm:$0xf]  ;;  %v2288_v33 = vld [vmem:[%s4027_s0 + $0x8] sm:$0xf0] }
   0x9   :  { %284 = vmatpush.bf16.msra.mxu3 %v3358_v11  ;;  %181 = vmatpush.bf16.msra.mxu1 %v3358_v11  ;;  %v3434_v34 = vor.u32 %v3101_v31, %v2286_v30  ;;  %v3438_v35 = vor.u32 %v3100_v32, %v2288_v33  ;;  %v3124_v36 = vld [vmem:[%s4028_s1 + $0x18] sm:$0xff]  ;;  %v3112_v37 = vld [vmem:[%s4028_s1] sm:$0xff]  ;;  %v3121_v40 = vld [vmem:[%s4029_s2 + $0x30] sm:$0xff]  ;;  %vm1500_vm13 = vcmask 195584  }
   0xa   :  { %v3122_v38 = vld [vmem:[%s4029_s2 + $0x38] sm:$0xff]  ;;  %v3134_v39 = vld [vmem:[%s4029_s2 + $0x80] sm:$0xff]  ;;  %v3120_v42 = vld [vmem:[%s4029_s2 + $0x28] sm:$0xff] }
   0xb   :  { %v3133_v41 = vld [vmem:[%s4029_s2 + $0x78] sm:$0xff]  ;;  %v3132_v43 = vld [vmem:[%s4029_s2 + $0x70] sm:$0xff]  ;;  %v3119_v44 = vld [vmem:[%s4029_s2 + $0x20] sm:$0xff] }
   0xc   :  { %261 = vmatpush.bf16.msra.mxu2 %v3374_v16  ;;  %158 = vmatpush.bf16.msra.mxu0 %v3374_v16  ;;  %v3131_v45 = vld [vmem:[%s4029_s2 + $0x68] sm:$0xff]  ;;  %v3125_v46 = vld [vmem:[%s4028_s1 + $0x20] sm:$0xff]  ;;  %v3118_v48 = vld [vmem:[%s4029_s2 + $0x18] sm:$0xff] }
   0xd   :  { %285 = vmatpush.bf16.msra.mxu3 %v3378_v17  ;;  %182 = vmatpush.bf16.msra.mxu1 %v3378_v17  ;;  %v3113_v47 = vld [vmem:[%s4028_s1 + $0x8] sm:$0xff]  ;;  %v3114_v50 = vld [vmem:[%s4028_s1 + $0x10] sm:$0xff]  ;;  %v3130_v51 = vld [vmem:[%s4029_s2 + $0x60] sm:$0xff] }
   0xe   :  { %v3126_v49 = vld [vmem:[%s4028_s1 + $0x28] sm:$0xff]  ;;  %v3117_v52 = vld [vmem:[%s4029_s2 + $0x10] sm:$0xff]  ;;  %v3129_v53 = vld [vmem:[%s4029_s2 + $0x58] sm:$0xff] }
   0xf   :  { %v3116_v54 = vld [vmem:[%s4029_s2 + $0x8] sm:$0xff]  ;;  %v3128_v56 = vld [vmem:[%s4029_s2 + $0x50] sm:$0xff]  ;;  %v3115_v57 = vld [vmem:[%s4029_s2] sm:$0xff] }
  0x10   :  { %262 = vmatpush.bf16.msra.mxu2 %v3394_v22  ;;  %159 = vmatpush.bf16.msra.mxu0 %v3394_v22  ;;  %v3135_v55 = vld [vmem:[%s4029_s2 + $0x88] sm:$0xff]  ;;  %v3123_v58 = vld [vmem:[%s4029_s2 + $0x40] sm:$0xff] }
  0x11   :  { %286 = vmatpush.bf16.msra.mxu3 %v3398_v23  ;;  %183 = vmatpush.bf16.msra.mxu1 %v3398_v23  ;;  %v3127_v59 = vld [vmem:[%s4029_s2 + $0x48] sm:$0xff] }
  0x14   :  { %263 = vmatpush.bf16.msra.mxu2 %v3414_v28  ;;  %160 = vmatpush.bf16.msra.mxu0 %v3414_v28 }
  0x15   :  { %287 = vmatpush.bf16.msra.mxu3 %v3418_v29  ;;  %184 = vmatpush.bf16.msra.mxu1 %v3418_v29 }
  0x18   :  { %264 = vmatpush.bf16.msra.mxu2 %v3434_v34  ;;  %161 = vmatpush.bf16.msra.mxu0 %v3434_v34 }
  0x19   :  { %288 = vmatpush.bf16.msra.mxu3 %v3438_v35  ;;  %185 = vmatpush.bf16.msra.mxu1 %v3438_v35 }
  0x1b   :  { %2356 = vmatmul.msk.bf16.vlgmr.msra.gmra.mxu2 %vm144_vm0, %v3124_v36  ;;  %2332 = vmatmul.msk.bf16.vlgmr.msra.gmra.mxu0 %vm144_vm0, %v3112_v37 }
  0x1c   :  { %2359 = vmatmul.msk.bf16.vlgmr.msra.gmra.mxu3 %vm144_vm0, %v3124_v36  ;;  %2335 = vmatmul.msk.bf16.vlgmr.msra.gmra.mxu1 %vm144_vm0, %v3112_v37  ;;  %v3149_v36 = vld [vmem:[%s4028_s1 + $0x50] sm:$0xff]  ;;  %v3146_v37 = vld [vmem:[%s4029_s2 + $0xc8] sm:$0xff] }
  0x1d   :  { %505 = vmatpush.bf16.msrb.mxu2 %v3122_v38  ;;  %394 = vmatpush.bf16.msrb.mxu0 %v3134_v39  ;;  %v3150_v38 = vld [vmem:[%s4028_s1 + $0x58] sm:$0xff]  ;;  %v3145_v39 = vld [vmem:[%s4029_s2 + $0xc0] sm:$0xff] }
  0x1e   :  { %425 = vmatpush.bf16.msrb.mxu1 %v3135_v55  ;;  %536 = vmatpush.bf16.msrb.mxu3 %v3123_v58 }
  0x21   :  { %506 = vmatpush.bf16.msrb.mxu2 %v3121_v40  ;;  %395 = vmatpush.bf16.msrb.mxu0 %v3133_v41 }
  0x22   :  { %610 = vmatpush.bf16.msra.mxu1 %v3344_v7 }
  0x25   :  { %507 = vmatpush.bf16.msrb.mxu2 %v3120_v42  ;;  %396 = vmatpush.bf16.msrb.mxu0 %v3132_v43 }
  0x26   :  { %611 = vmatpush.bf16.msra.mxu1 %v3358_v11 }
  0x29   :  { %508 = vmatpush.bf16.msrb.mxu2 %v3119_v44  ;;  %397 = vmatpush.bf16.msrb.mxu0 %v3131_v45  ;;  %v3144_v45 = vld [vmem:[%s4029_s2 + $0xb8] sm:$0xff] }
  0x2a   :  { %612 = vmatpush.bf16.msra.mxu1 %v3378_v17 }
  0x2b   :  { %2357 = vmatmul.msk.bf16.gmra.mxu2 %vm144_vm0, %v3125_v46  ;;  %2333 = vmatmul.msk.bf16.gmra.mxu0 %vm144_vm0, %v3113_v47 }
  0x2c   :  { %2360 = vmatmul.msk.bf16.gmra.mxu3 %vm144_vm0, %v3125_v46  ;;  %2336 = vmatmul.msk.bf16.gmra.mxu1 %vm144_vm0, %v3113_v47 }
  0x2d   :  { %509 = vmatpush.bf16.msrb.mxu2 %v3118_v48  ;;  %398 = vmatpush.bf16.msrb.mxu0 %v3130_v51  ;;  %v3143_v48 = vld [vmem:[%s4029_s2 + $0xb0] sm:$0xff] }
  0x2e   :  { %613 = vmatpush.bf16.msra.mxu1 %v3398_v23 }
  0x31   :  { %510 = vmatpush.bf16.msrb.mxu2 %v3117_v52  ;;  %399 = vmatpush.bf16.msrb.mxu0 %v3129_v53  ;;  %v3142_v53 = vld [vmem:[%s4029_s2 + $0xa8] sm:$0xff] }
  0x32   :  { %614 = vmatpush.bf16.msra.mxu1 %v3418_v29 }
  0x35   :  { %511 = vmatpush.bf16.msrb.mxu2 %v3116_v54  ;;  %400 = vmatpush.bf16.msrb.mxu0 %v3128_v56  ;;  %v3141_v54 = vld [vmem:[%s4029_s2 + $0xa0] sm:$0xff] }
  0x36   :  { %615 = vmatpush.bf16.msra.mxu1 %v3438_v35 }
  0x39   :  { %512 = vmatpush.bf16.msrb.mxu2 %v3115_v57  ;;  %401 = vmatpush.bf16.msrb.mxu0 %v3127_v59  ;;  %v3147_v59 = vld [vmem:[%s4029_s2 + $0xd0] sm:$0xff] }
  0x3a   :  { %751 = vmatpush.bf16.msra.mxu3 %v3147_v59 }
  0x3b   :  { %2358 = vmatmul.msk.bf16.gmra.mxu2 %vm144_vm0, %v3126_v49  ;;  %2334 = vmatmul.msk.bf16.gmra.mxu0 %vm144_vm0, %v3114_v50 }
  0x3c   :  { %2361 = vmatmul.msk.bf16.gmra.mxu3 %vm144_vm0, %v3126_v49  ;;  %2337 = vmatmul.msk.bf16.gmra.mxu1 %vm144_vm0, %v3114_v50 }
  0x3d   :  { %586 = vmatpush.bf16.msra.mxu0 %v3333_v3  ;;  %720 = vmatpush.bf16.msra.mxu2 %v3146_v37 }
  0x41   :  { %587 = vmatpush.bf16.msra.mxu0 %v3354_v10  ;;  %721 = vmatpush.bf16.msra.mxu2 %v3145_v39 }
  0x45   :  { %588 = vmatpush.bf16.msra.mxu0 %v3374_v16  ;;  %722 = vmatpush.bf16.msra.mxu2 %v3144_v45 }
  0x49   :  { %589 = vmatpush.bf16.msra.mxu0 %v3394_v22  ;;  %723 = vmatpush.bf16.msra.mxu2 %v3143_v48 }
  0x4d   :  { %590 = vmatpush.bf16.msra.mxu0 %v3414_v28  ;;  %724 = vmatpush.bf16.msra.mxu2 %v3142_v53 }
  0x51   :  { %591 = vmatpush.bf16.msra.mxu0 %v3434_v34  ;;  %725 = vmatpush.bf16.msra.mxu2 %v3141_v54 }
  0x98   :  { %v163_v60 = vpop.f32.mrf.mxu0 }
  0x99   :  { %v187_v61 = vpop.f32.mrf.mxu1 }
  0x9e   :  { %v266_v62 = vpop.f32.mrf.mxu2 }
  0x9f   :  { %v290_v63 = vpop.f32.mrf.mxu3 }
  0xa0   :  { %v165_v0 = vpop.f32.mrf.mxu0 }
  0xa1   :  { %v202_v1 = vpack.c.bf16 %v165_v0, %v163_v60  ;;  %v189_v2 = vpop.f32.mrf.mxu1  ;;  %v3140_v60 = vld [vmem:[%s4029_s2 + $0x98] sm:$0xff]  ;;  %v3139_v0 = vld [vmem:[%s4029_s2 + $0x90] sm:$0xff] }
  0xa2   :  { %v203_v4 = vpack.c.bf16 %v189_v2, %v187_v61  ;;  %726 = vmatpush.bf16.msra.mxu2 %v3140_v60 }
  0xa3   :  { %513 = vmatmul.bf16.vlgmr.msrb.gmra.mxu2 %v202_v1 }
  0xa4   :  { %2455 = vmatmul.msk.bf16.vlgmr.msrb.gmra.mxu3 %vm384_vm1, %v203_v4 }
  0xa6   :  { %v268_v5 = vpop.f32.mrf.mxu2  ;;  %727 = vmatpush.bf16.msra.mxu2 %v3139_v0 }
  0xa7   :  { %v305_v6 = vpack.c.bf16 %v268_v5, %v266_v62  ;;  %v292_v8 = vpop.f32.mrf.mxu3 }
  0xa8   :  { %v306_v9 = vpack.c.bf16 %v292_v8, %v290_v63  ;;  %v168_v12 = vpop.f32.mrf.mxu0 }
  0xa9   :  { %402 = vmatmul.bf16.vlgmr.msrb.gmra.mxu0 %v305_v6  ;;  %v192_v13 = vpop.f32.mrf.mxu1 }
  0xaa   :  { %2416 = vmatmul.msk.bf16.vlgmr.msrb.gmra.mxu1 %vm384_vm1, %v306_v9  ;;  %807 = vmatpush.bf16.msrb.mxu0 %v3333_v3 }
  0xab   :  { %831 = vmatpush.bf16.msrb.mxu1 %v3344_v7 }
  0xae   :  { %v271_v14 = vpop.f32.mrf.mxu2  ;;  %808 = vmatpush.bf16.msrb.mxu0 %v3354_v10 }
  0xaf   :  { %v295_v15 = vpop.f32.mrf.mxu3  ;;  %832 = vmatpush.bf16.msrb.mxu1 %v3358_v11 }
  0xb0   :  { %v170_v18 = vpop.f32.mrf.mxu0 }
  0xb1   :  { %v194_v19 = vpop.f32.mrf.mxu1  ;;  %v204_v20 = vpack.c.bf16 %v170_v18, %v168_v12 }
  0xb2   :  { %v205_v21 = vpack.c.bf16 %v194_v19, %v192_v13  ;;  %809 = vmatpush.bf16.msrb.mxu0 %v3374_v16 }
  0xb3   :  { %518 = vmatmul.bf16.gmra.mxu2 %v204_v20  ;;  %833 = vmatpush.bf16.msrb.mxu1 %v3378_v17  ;;  %v3158_v20 = vld [vmem:[%s4029_s2 + $0x110] sm:$0xff] }
  0xb4   :  { %2456 = vmatmul.msk.bf16.gmra.mxu3 %vm384_vm1, %v205_v21  ;;  %941 = vmatpush.bf16.msrb.mxu2 %v3158_v20  ;;  %v3157_v21 = vld [vmem:[%s4029_s2 + $0x108] sm:$0xff] }
  0xb6   :  { %v273_v3 = vpop.f32.mrf.mxu2  ;;  %810 = vmatpush.bf16.msrb.mxu0 %v3394_v22 }
  0xb7   :  { %v297_v7 = vpop.f32.mrf.mxu3  ;;  %v307_v24 = vpack.c.bf16 %v273_v3, %v271_v14  ;;  %834 = vmatpush.bf16.msrb.mxu1 %v3398_v23 }
  0xb8   :  { %v308_v10 = vpack.c.bf16 %v297_v7, %v295_v15  ;;  %v173_v11 = vpop.f32.mrf.mxu0  ;;  %942 = vmatpush.bf16.msrb.mxu2 %v3157_v21 }
  0xb9   :  { %407 = vmatmul.bf16.gmra.mxu0 %v307_v24  ;;  %v197_v25 = vpop.f32.mrf.mxu1  ;;  %v3156_v24 = vld [vmem:[%s4029_s2 + $0x100] sm:$0xff] }
  0xba   :  { %2417 = vmatmul.msk.bf16.gmra.mxu1 %vm384_vm1, %v308_v10  ;;  %811 = vmatpush.bf16.msrb.mxu0 %v3414_v28  ;;  %v3136_v28 = vld [vmem:[%s4028_s1 + $0x30] sm:$0xff]  ;;  %v3155_v10 = vld [vmem:[%s4029_s2 + $0xf8] sm:$0xff] }
  0xbb   :  { %835 = vmatpush.bf16.msrb.mxu1 %v3418_v29  ;;  %v3137_v29 = vld [vmem:[%s4028_s1 + $0x38] sm:$0xff] }
  0xbc   :  { %943 = vmatpush.bf16.msrb.mxu2 %v3156_v24 }
  0xbe   :  { %v276_v16 = vpop.f32.mrf.mxu2  ;;  %812 = vmatpush.bf16.msrb.mxu0 %v3434_v34  ;;  %v3138_v34 = vld [vmem:[%s4028_s1 + $0x40] sm:$0xff] }
  0xbf   :  { %v300_v17 = vpop.f32.mrf.mxu3  ;;  %836 = vmatpush.bf16.msrb.mxu1 %v3438_v35  ;;  %v3148_v35 = vld [vmem:[%s4028_s1 + $0x48] sm:$0xff] }
  0xc0   :  { %v175_v22 = vpop.f32.mrf.mxu0  ;;  %944 = vmatpush.bf16.msrb.mxu2 %v3155_v10 }
  0xc1   :  { %v199_v26 = vpop.f32.mrf.mxu1  ;;  %v206_v27 = vpack.c.bf16 %v175_v22, %v173_v11  ;;  %v3154_v22 = vld [vmem:[%s4029_s2 + $0xf0] sm:$0xff] }
  0xc2   :  { %v207_v23 = vpack.c.bf16 %v199_v26, %v197_v25  ;;  %v3153_v26 = vld [vmem:[%s4029_s2 + $0xe8] sm:$0xff] }
  0xc3   :  { %523 = vmatmul.bf16.gmra.mxu2 %v206_v27 }
  0xc4   :  { %2457 = vmatmul.msk.bf16.gmra.mxu3 %vm384_vm1, %v207_v23  ;;  %945 = vmatpush.bf16.msrb.mxu2 %v3154_v22 }
  0xc6   :  { %v278_v30 = vpop.f32.mrf.mxu2 }
  0xc7   :  { %v302_v31 = vpop.f32.mrf.mxu3  ;;  %v309_v32 = vpack.c.bf16 %v278_v30, %v276_v16  ;;  %v3159_v30 = vld [vmem:[%s4029_s2 + $0x118] sm:$0xff] }
  0xc8   :  { %v310_v33 = vpack.c.bf16 %v302_v31, %v300_v17  ;;  %946 = vmatpush.bf16.msrb.mxu2 %v3153_v26  ;;  %v3152_v31 = vld [vmem:[%s4029_s2 + $0xe0] sm:$0xff]  ;;  %972 = vmatpush.bf16.msrb.mxu3 %v3159_v30  ;;  %v3172_v30 = vld [vmem:[%s4031_s5 + $0x50] sm:$0xff] }
  0xc9   :  { %412 = vmatmul.bf16.gmra.mxu0 %v309_v32  ;;  %v3151_v32 = vld [vmem:[%s4029_s2 + $0xd8] sm:$0xff] }
  0xca   :  { %2418 = vmatmul.msk.bf16.gmra.mxu1 %vm384_vm1, %v310_v33 }
  0xcc   :  { %947 = vmatpush.bf16.msrb.mxu2 %v3152_v31 }
  0xd0   :  { %948 = vmatpush.bf16.msrb.mxu2 %v3151_v32 }
  0xd9   :  { %2476 = vmatmul.msk.bf16.vlgmr.msra.gmra.mxu0 %vm144_vm0, %v3136_v28 }
  0xda   :  { %2479 = vmatmul.msk.bf16.vlgmr.msra.gmra.mxu1 %vm144_vm0, %v3136_v28 }
  0xe9   :  { %2477 = vmatmul.msk.bf16.gmra.mxu0 %vm144_vm0, %v3137_v29 }
  0xea   :  { %2480 = vmatmul.msk.bf16.gmra.mxu1 %vm144_vm0, %v3137_v29 }
  0xf9   :  { %2478 = vmatmul.msk.bf16.gmra.mxu0 %vm144_vm0, %v3138_v34 }
  0xfa   :  { %2481 = vmatmul.msk.bf16.gmra.mxu1 %vm144_vm0, %v3138_v34 }
 0x109   :  { %2557 = vmatmul.msk.bf16.vlgmr.msrb.gmra.mxu0 %vm144_vm0, %v3148_v35 }
 0x10a   :  { %2560 = vmatmul.msk.bf16.vlgmr.msrb.gmra.mxu1 %vm144_vm0, %v3148_v35 }
 0x119   :  { %2558 = vmatmul.msk.bf16.gmra.mxu0 %vm144_vm0, %v3149_v36 }
 0x11a   :  { %2561 = vmatmul.msk.bf16.gmra.mxu1 %vm144_vm0, %v3149_v36 }
 0x126   :  { %v403_v40 = vpop.f32.mrf.mxu0  ;;  %v514_v41 = vpop.f32.mrf.mxu2 }
 0x127   :  { %v427_v42 = vpop.f32.mrf.mxu1  ;;  %v538_v43 = vpop.f32.mrf.mxu3 }
 0x128   :  { %v428_v44 = vadd.f32 %v427_v42, %v403_v40 }
 0x129   :  { %2559 = vmatmul.msk.bf16.gmra.mxu0 %vm144_vm0, %v3150_v38 }
 0x12a   :  { %v515_v46 = vadd.f32 %v514_v41, %v428_v44  ;;  %2562 = vmatmul.msk.bf16.gmra.mxu1 %vm144_vm0, %v3150_v38 }
 0x12c   :  { %v3597_v47 = vadd.f32 %v538_v43, %v515_v46 }
 0x12e   :  { %v3602_v49 = vpop.f32.mrf.mxu0  ;;  %v3604_v50 = vpop.f32.mrf.mxu2 }
 0x12f   :  { %v3606_v51 = vpop.f32.mrf.mxu1  ;;  %v3608_v52 = vpop.f32.mrf.mxu3 }
 0x136   :  { %v408_v55 = vpop.f32.mrf.mxu0  ;;  %v519_v56 = vpop.f32.mrf.mxu2 }
 0x137   :  { %v432_v57 = vpop.f32.mrf.mxu1  ;;  %v543_v58 = vpop.f32.mrf.mxu3 }
 0x138   :  { %v433_v61 = vadd.f32 %v432_v57, %v408_v55 }
 0x13a   :  { %v520_v62 = vadd.f32 %v519_v56, %v433_v61 }
 0x13c   :  { %v3622_v63 = vadd.f32 %v543_v58, %v520_v62 }
 0x13e   :  { %v3627_v1 = vpop.f32.mrf.mxu0  ;;  %v3629_v2 = vpop.f32.mrf.mxu2 }
 0x13f   :  { %v3631_v4 = vpop.f32.mrf.mxu1  ;;  %v3633_v5 = vpop.f32.mrf.mxu3 }
 0x146   :  { %v413_v6 = vpop.f32.mrf.mxu0  ;;  %v524_v9 = vpop.f32.mrf.mxu2 }
 0x147   :  { %v437_v8 = vpop.f32.mrf.mxu1  ;;  %v548_v13 = vpop.f32.mrf.mxu3 }
 0x148   :  { %v438_v12 = vadd.f32 %v437_v8, %v413_v6 }
 0x14a   :  { %v525_v14 = vadd.f32 %v524_v9, %v438_v12 }
 0x14c   :  { %v3635_v15 = vadd.f32 %v548_v13, %v525_v14 }
 0x14e   :  { %v3637_v18 = vpop.f32.mrf.mxu0  ;;  %v3674_v6 = vpop.f32.mrf.mxu2 }
 0x14f   :  { %v3639_v19 = vpop.f32.mrf.mxu1  ;;  %v3676_v8 = vpop.f32.mrf.mxu3 }
 0x156   :  { %v593_v3 = vpop.f32.mrf.mxu0 }
 0x157   :  { %v617_v7 = vpop.f32.mrf.mxu1 }
 0x15e   :  { %v595_v11 = vpop.f32.mrf.mxu0 }
 0x15f   :  { %v632_v25 = vpack.c.bf16 %v595_v11, %v593_v3  ;;  %v619_v16 = vpop.f32.mrf.mxu1 }
 0x160   :  { %v633_v17 = vpack.c.bf16 %v619_v16, %v617_v7 }
 0x161   :  { %728 = vmatmul.bf16.vlgmr.msra.gmra.mxu2 %v632_v25 }
 0x162   :  { %2536 = vmatmul.msk.bf16.vlgmr.msra.gmra.mxu3 %vm384_vm1, %v633_v17 }
 0x166   :  { %v598_v27 = vpop.f32.mrf.mxu0 }
 0x167   :  { %v622_v23 = vpop.f32.mrf.mxu1 }
 0x16e   :  { %v600_v33 = vpop.f32.mrf.mxu0 }
 0x16f   :  { %v624_v28 = vpop.f32.mrf.mxu1  ;;  %v634_v29 = vpack.c.bf16 %v600_v33, %v598_v27  ;;  %v3173_v27 = vld [vmem:[%s4031_s5 + $0x58] sm:$0xff]  ;;  %v3170_v33 = vld [vmem:[%s4031_s5 + $0x40] sm:$0xff] }
 0x170   :  { %v635_v34 = vpack.c.bf16 %v624_v28, %v622_v23  ;;  %1171 = vmatpush.bf16.msra.mxu2 %v3173_v27  ;;  %v3169_v28 = vld [vmem:[%s4031_s5 + $0x38] sm:$0xff] }
 0x171   :  { %733 = vmatmul.bf16.gmra.mxu2 %v634_v29  ;;  %v435_v29 = vadd.f32 %v3631_v4, %v3627_v1 }
 0x172   :  { %2537 = vmatmul.msk.bf16.gmra.mxu3 %vm384_vm1, %v635_v34 }
 0x174   :  { %1172 = vmatpush.bf16.msra.mxu2 %v3172_v30 }
 0x176   :  { %v603_v35 = vpop.f32.mrf.mxu0 }
 0x177   :  { %v627_v36 = vpop.f32.mrf.mxu1 }
 0x17e   :  { %v605_v37 = vpop.f32.mrf.mxu0 }
 0x17f   :  { %v629_v38 = vpop.f32.mrf.mxu1  ;;  %v636_v39 = vpack.c.bf16 %v605_v37, %v603_v35  ;;  %v3168_v35 = vld [vmem:[%s4031_s5 + $0x30] sm:$0xff] }
 0x180   :  { %v637_v40 = vpack.c.bf16 %v629_v38, %v627_v36  ;;  %v522_v38 = vadd.f32 %v3629_v2, %v435_v29  ;;  %v430_v2 = vadd.f32 %v3606_v51, %v3602_v49 }
 0x181   :  { %738 = vmatmul.bf16.gmra.mxu2 %v636_v39 }
 0x182   :  { %2538 = vmatmul.msk.bf16.gmra.mxu3 %vm384_vm1, %v637_v40 }
 0x186   :  { %v814_v41 = vpop.f32.mrf.mxu0 }
 0x187   :  { %v838_v42 = vpop.f32.mrf.mxu1 }
 0x18e   :  { %v816_v43 = vpop.f32.mrf.mxu0 }
 0x18f   :  { %v853_v44 = vpack.c.bf16 %v816_v43, %v814_v41  ;;  %v840_v45 = vpop.f32.mrf.mxu1  ;;  %v546_v41 = vadd.f32 %v3633_v5, %v522_v38  ;;  %v3165_v38 = vld [vmem:[%s4031_s5 + $0x20] sm:$0xff] }
 0x190   :  { %v854_v46 = vpack.c.bf16 %v840_v45, %v838_v42  ;;  %v3240_v42 = vld [vmem:[%s4030_s3] ss:$0 sm:$0xff] }
 0x191   :  { %949 = vmatmul.bf16.vlgmr.msrb.gmra.mxu2 %v853_v44 }
 0x192   :  { %2617 = vmatmul.msk.bf16.vlgmr.msrb.gmra.mxu3 %vm384_vm1, %v854_v46 }
 0x196   :  { %v819_v48 = vpop.f32.mrf.mxu0 }
 0x197   :  { %v843_v53 = vpop.f32.mrf.mxu1 }
 0x19e   :  { %v821_v54 = vpop.f32.mrf.mxu0 }
 0x19f   :  { %v855_v55 = vpack.c.bf16 %v821_v54, %v819_v48  ;;  %v845_v56 = vpop.f32.mrf.mxu1  ;;  %v440_v54 = vadd.f32 %v3639_v19, %v3637_v18 }
 0x1a0   :  { %v856_v57 = vpack.c.bf16 %v845_v56, %v843_v53 }
 0x1a1   :  { %954 = vmatmul.bf16.gmra.mxu2 %v855_v55 }
 0x1a2   :  { %2618 = vmatmul.msk.bf16.gmra.mxu3 %vm384_vm1, %v856_v57 }
 0x1a6   :  { %v824_v58 = vpop.f32.mrf.mxu0 }
 0x1a7   :  { %v848_v59 = vpop.f32.mrf.mxu1 }
 0x1ae   :  { %v826_v60 = vpop.f32.mrf.mxu0 }
 0x1af   :  { %v857_v61 = vpack.c.bf16 %v826_v60, %v824_v58  ;;  %v850_v62 = vpop.f32.mrf.mxu1 }
 0x1b0   :  { %v858_v0 = vpack.c.bf16 %v850_v62, %v848_v59 }
 0x1b1   :  { %959 = vmatmul.bf16.gmra.mxu2 %v857_v61  ;;  %v517_v61 = vadd.f32 %v3604_v50, %v430_v2 }
 0x1b2   :  { %2619 = vmatmul.msk.bf16.gmra.mxu3 %vm384_vm1, %v858_v0  ;;  %v527_v0 = vadd.f32 %v3674_v6, %v440_v54  ;;  %vm1886_vm1 = vcmask 1045504  }
 0x1b3   :  { %v541_v18 = vadd.f32 %v3608_v52, %v517_v61 }
 0x1b4   :  { %v551_v19 = vadd.f32 %v3676_v8, %v527_v0 }
 0x1e4   :  { %v729_v9 = vpop.f32.mrf.mxu2 }
 0x1e5   :  { %v753_v12 = vpop.f32.mrf.mxu3 }
 0x1e6   :  { %v754_v13 = vadd.f32 %v753_v12, %v729_v9 }
 0x1e8   :  { %v3679_v14 = vadd.f32 %v754_v13, %v3597_v47 }
 0x1ec   :  { %v731_v20 = vpop.f32.mrf.mxu2 }
 0x1ed   :  { %v755_v21 = vpop.f32.mrf.mxu3 }
 0x1ee   :  { %v756_v49 = vadd.f32 %v755_v21, %v731_v20 }
 0x1f4   :  { %v734_v3 = vpop.f32.mrf.mxu2 }
 0x1f5   :  { %v758_v7 = vpop.f32.mrf.mxu3 }
 0x1f6   :  { %v759_v24 = vadd.f32 %v758_v7, %v734_v3  ;;  %v769_v7 = vadd.f32 %v756_v49, %v541_v18 }
 0x1f8   :  { %v770_v10 = vadd.f32 %v759_v24, %v3622_v63  ;;  %v3171_v63 = vld [vmem:[%s4031_s5 + $0x48] sm:$0xff] }
 0x1f9   :  { %1173 = vmatpush.bf16.msra.mxu2 %v3171_v63 }
 0x1fc   :  { %v736_v11 = vpop.f32.mrf.mxu2 }
 0x1fd   :  { %v760_v25 = vpop.f32.mrf.mxu3  ;;  %1174 = vmatpush.bf16.msra.mxu2 %v3170_v33  ;;  %v1028_v33 = vld [vmem:[%s4032_s4 + $0x8] sm:$0xf] }
 0x1fe   :  { %v761_v39 = vadd.f32 %v760_v25, %v736_v11  ;;  %v1034_v29 = vunpack.c.l.b16 %v1028_v33 }
 0x200   :  { %v771_v43 = vadd.f32 %v761_v39, %v546_v41  ;;  %v3164_v39 = vld [vmem:[%s4031_s5 + $0x18] sm:$0xff]  ;;  %v2701_v41 = vld [vmem:[%s4032_s4 + $0x20] sm:$0xf] }
 0x201   :  { %1175 = vmatpush.bf16.msra.mxu2 %v3169_v28  ;;  %v2628_v28 = vld [vmem:[%s4032_s4 + $0x14] sm:$0xf] }
 0x204   :  { %v739_v16 = vpop.f32.mrf.mxu2 }
 0x205   :  { %v763_v17 = vpop.f32.mrf.mxu3  ;;  %1176 = vmatpush.bf16.msra.mxu2 %v3168_v35  ;;  %v1036_v35 = vpack.c.b16 %v1034_v29, %v1034_v29 }
 0x206   :  { %v764_v5 = vadd.f32 %v763_v17, %v739_v16 }
 0x208   :  { %v772_v9 = vadd.f32 %v764_v5, %v3635_v15  ;;  %v3176_v5 = vld [vmem:[%s4031_s5 + $0x68] sm:$0xff] }
 0x20c   :  { %v741_v22 = vpop.f32.mrf.mxu2 }
 0x20d   :  { %v765_v26 = vpop.f32.mrf.mxu3 }
 0x20e   :  { %v766_v51 = vadd.f32 %v765_v26, %v741_v22 }
 0x214   :  { %v950_v23 = vpop.f32.mrf.mxu2 }
 0x215   :  { %v974_v47 = vpop.f32.mrf.mxu3 }
 0x216   :  { %v975_v11 = vadd.f32 %v974_v47, %v950_v23 }
 0x218   :  { %v989_v6 = vadd.f32 %v975_v11, %v3679_v14 }
 0x21a   :  { %v999_v22 = vadd.f32 %v3240_v42, %v989_v6 }
 0x21c   :  { %v952_v31 = vpop.f32.mrf.mxu2  ;;  %v1011_v23 = vmul.f32 0.2, %v999_v22  ;;  %vm1005_vm7 = vcmp.ge.f32.partialorder %v999_v22, 0.0 }
 0x21d   :  { %v976_v32 = vpop.f32.mrf.mxu3 }
 0x21e   :  { %v977_v13 = vadd.f32 %v976_v32, %v952_v31  ;;  %v1017_v14 = vsel %vm1005_vm7, %v999_v22, %v1011_v23  ;;  %v3160_v31 = vld [vmem:[%s4032_s4] sm:$0xff]  ;;  %v3167_v32 = vld [vmem:[%s4032_s4 + $0xc] sm:$0xff] }
 0x220   :  { %v990_v16 = vadd.f32 %v977_v13, %v769_v7 }
 0x222   :  { %v1000_v21 = vadd.f32 %v3240_v42, %v990_v16  ;;  %v3185_v16 = vld [vmem:[%s4031_s5 + $0xa8] sm:$0xff] }
 0x224   :  { %v955_v34 = vpop.f32.mrf.mxu2  ;;  %v1012_v30 = vmul.f32 0.2, %v1000_v21  ;;  %vm1006_vm6 = vcmp.ge.f32.partialorder %v1000_v21, 0.0 }
 0x225   :  { %v979_v36 = vpop.f32.mrf.mxu3 }
 0x226   :  { %v980_v37 = vadd.f32 %v979_v36, %v955_v34  ;;  %v1018_v47 = vsel %vm1006_vm6, %v1000_v21, %v1012_v30  ;;  %v1085_v34 = vunpack.c.l.b16 %v2628_v28  ;;  %v3183_v21 = vld [vmem:[%s4031_s5 + $0x98] sm:$0xff] }
 0x227   :  { %v1023_v63 = vpack.c.bf16 %v1018_v47, %v1017_v14 }
 0x228   :  { %v991_v40 = vadd.f32 %v980_v37, %v770_v10  ;;  %v773_v10 = vadd.f32 %v766_v51, %v551_v19  ;;  %v1087_v36 = vpack.c.b16 %v1085_v34, %v1085_v34  ;;  %v3166_v37 = vld [vmem:[%s4031_s5 + $0x28] sm:$0xff] }
 0x229   :  { %1231 = vmatpush.bf16.msra.mxu3 %v3166_v37 }
 0x22a   :  { %v1001_v44 = vadd.f32 %v3240_v42, %v991_v40  ;;  %v3174_v40 = vld [vmem:[%s4032_s4 + $0x18] sm:$0xff] }
 0x22c   :  { %v957_v1 = vpop.f32.mrf.mxu2  ;;  %v1013_v48 = vmul.f32 0.2, %v1001_v44  ;;  %vm1007_vm2 = vcmp.ge.f32.partialorder %v1001_v44, 0.0 }
 0x22d   :  { %v981_v4 = vpop.f32.mrf.mxu3  ;;  %1232 = vmatpush.bf16.msra.mxu3 %v3165_v38 }
 0x22e   :  { %v982_v45 = vadd.f32 %v981_v4, %v957_v1  ;;  %v1019_v59 = vsel %vm1007_vm2, %v1001_v44, %v1013_v48  ;;  %v3163_v4 = vld [vmem:[%s4031_s5 + $0x10] sm:$0xff]  ;;  %v3161_v44 = vld [vmem:[%s4031_s5] sm:$0xff]  ;;  %v3178_v48 = vld [vmem:[%s4031_s5 + $0x78] sm:$0xff]  ;;  %vm1882_vm2 = vcmask 97280  }
 0x230   :  { %v992_v46 = vadd.f32 %v982_v45, %v771_v43  ;;  %v3162_v43 = vld [vmem:[%s4031_s5 + $0x8] sm:$0xff] }
 0x231   :  { %1233 = vmatpush.bf16.msra.mxu3 %v3164_v39  ;;  %v3180_v45 = vld [vmem:[%s4031_s5 + $0x88] sm:$0xff] }
 0x232   :  { %v1002_v53 = vadd.f32 %v3240_v42, %v992_v46  ;;  %v3179_v46 = vld [vmem:[%s4031_s5 + $0x80] sm:$0xff] }
 0x234   :  { %vm1008_vm3 = vcmp.ge.f32.partialorder %v1002_v53, 0.0  ;;  %v1014_v55 = vmul.f32 0.2, %v1002_v53  ;;  %v960_v56 = vpop.f32.mrf.mxu2 }
 0x235   :  { %v984_v57 = vpop.f32.mrf.mxu3  ;;  %1234 = vmatpush.bf16.msra.mxu3 %v3163_v4  ;;  %v3198_v4 = vld [vmem:[%s4034_s8 + $0x40] sm:$0xff] }
 0x236   :  { %v985_v58 = vadd.f32 %v984_v57, %v960_v56  ;;  %v1020_v60 = vsel %vm1008_vm3, %v1002_v53, %v1014_v55  ;;  %v3177_v53 = vld [vmem:[%s4031_s5 + $0x70] sm:$0xff]  ;;  %v3175_v55 = vld [vmem:[%s4031_s5 + $0x60] sm:$0xff] }
 0x237   :  { %v1024_v62 = vpack.c.bf16 %v1020_v60, %v1019_v59 }
 0x238   :  { %v993_v12 = vadd.f32 %v985_v58, %v772_v9 }
 0x239   :  { %1235 = vmatpush.bf16.msra.mxu3 %v3162_v43  ;;  %v3197_v43 = vld [vmem:[%s4034_s8 + $0x38] sm:$0xff] }
 0x23a   :  { %v1003_v25 = vadd.f32 %v3240_v42, %v993_v12  ;;  %v3181_v12 = vld [vmem:[%s4032_s4 + $0x24] sm:$0xff] }
 0x23c   :  { %v962_v3 = vpop.f32.mrf.mxu2  ;;  %v1015_v15 = vmul.f32 0.2, %v1003_v25  ;;  %vm1009_vm4 = vcmp.ge.f32.partialorder %v1003_v25, 0.0 }
 0x23d   :  { %v986_v24 = vpop.f32.mrf.mxu3  ;;  %1236 = vmatpush.bf16.msra.mxu3 %v3161_v44  ;;  %v3196_v44 = vld [vmem:[%s4034_s8 + $0x30] sm:$0xff] }
 0x23e   :  { %v987_v50 = vadd.f32 %v986_v24, %v962_v3  ;;  %v1021_v8 = vsel %vm1009_vm4, %v1003_v25, %v1015_v15  ;;  %v2748_v3 = vld [vmem:[%s4032_s4 + $0x2c] sm:$0xf]  ;;  %v3187_v25 = vld [vmem:[%s4031_s5 + $0xb8] sm:$0xff]  ;;  %vm2262_vm4 = vcmask 779264  }
 0x23f   :  { %v1370_v7 = vunpack.c.l.b16 %v2748_v3  ;;  %v3188_v3 = vld [vmem:[%s4035_s7] sm:$0x30] }
 0x240   :  { %v994_v17 = vadd.f32 %v987_v50, %v773_v10  ;;  %v3186_v50 = vld [vmem:[%s4031_s5 + $0xb0] sm:$0xff] }
 0x241   :  { %v1372_v10 = vpack.c.b16 %v1370_v7, %v1370_v7  ;;  %1456 = vmatpush.bf16.msrb.mxu3 %v3187_v25  ;;  %v2802_v7 = vld [vmem:[%s4035_s7 + $0x8] sm:$0xf]  ;;  %v2871_v25 = vld [vmem:[%s4035_s7 + $0x10] sm:$0xf] }
 0x242   :  { %v1004_v20 = vadd.f32 %v3240_v42, %v994_v17  ;;  %v1256_v42 = vunpack.c.l.b16 %v2701_v41  ;;  %v3184_v17 = vld [vmem:[%s4031_s5 + $0xa0] sm:$0xff]  ;;  %v3201_v41 = vld [vmem:[%s4034_s8 + $0x58] sm:$0xff] }
 0x244   :  { %vm1010_vm5 = vcmp.ge.f32.partialorder %v1004_v20, 0.0  ;;  %v1016_v52 = vmul.f32 0.2, %v1004_v20  ;;  %v1258_v1 = vpack.c.b16 %v1256_v42, %v1256_v42  ;;  %v3200_v42 = vld [vmem:[%s4034_s8 + $0x50] sm:$0xff] }
 0x245   :  { %1457 = vmatpush.bf16.msrb.mxu3 %v3186_v50  ;;  %v3202_v50 = vld [vmem:[%s4035_s7 + $0x10] sm:$0x30] }
 0x246   :  { %v1022_v26 = vsel %vm1010_vm5, %v1004_v20, %v1016_v52  ;;  %v3182_v52 = vld [vmem:[%s4031_s5 + $0x90] sm:$0xff]  ;;  %vm2266_vm5 = vcmask 1024  }
 0x247   :  { %v1025_v27 = vpack.c.bf16 %v1022_v26, %v1021_v8 }
 0x249   :  { %1049 = vmatpush.bf16.msra.mxu0 %v1025_v27  ;;  %1099 = vmatpush.bf16.msra.mxu1 %v1025_v27 }
 0x24a   :  { %1384 = vmatpush.bf16.msrb.mxu2 %v1025_v27  ;;  %1458 = vmatpush.bf16.msrb.mxu3 %v3185_v16  ;;  %v2872_v16 = vor.u32 %v3202_v50, %v2871_v25  ;;  %v3020_v25 = vld [vmem:[%s4037_s10 + $0x8] sm:$0x7]  ;;  %v3059_v50 = vld [vmem:[%s4037_s10 + $0xc] sm:$0x7] }
 0x24d   :  { %1050 = vmatpush.bf16.msra.mxu0 %v1024_v62  ;;  %1100 = vmatpush.bf16.msra.mxu1 %v1024_v62 }
 0x24e   :  { %1385 = vmatpush.bf16.msrb.mxu2 %v1024_v62  ;;  %1459 = vmatpush.bf16.msrb.mxu3 %v3184_v17  ;;  %v3192_v17 = vld [vmem:[%s4034_s8 + $0x18] sm:$0xff] }
 0x251   :  { %1051 = vmatpush.bf16.msra.mxu0 %v1023_v63  ;;  %1101 = vmatpush.bf16.msra.mxu1 %v1023_v63 }
 0x252   :  { %1386 = vmatpush.bf16.msrb.mxu2 %v1023_v63  ;;  %1460 = vmatpush.bf16.msrb.mxu3 %v3183_v21  ;;  %v3207_v21 = vld [vmem:[%s4034_s8 + $0x80] sm:$0xff] }
 0x254   :  { %2624 = vmatmul.msk.bf16.vlgmr.msra.gmra.mxu0 %vm1037_vm8, %v3160_v31  ;;  %2633 = vmatmul.msk.bf16.vlgmr.msra.gmra.mxu1 %vm1037_vm8, %v3167_v32 }
 0x255   :  { %1270 = vmatpush.bf16.msrb.mxu0 %v1025_v27  ;;  %1342 = vmatpush.bf16.msrb.mxu1 %v3180_v45 }
 0x256   :  { %1461 = vmatpush.bf16.msrb.mxu3 %v3182_v52  ;;  %v3189_v52 = vld [vmem:[%s4034_s8] sm:$0xff] }
 0x259   :  { %1271 = vmatpush.bf16.msrb.mxu0 %v1024_v62  ;;  %1343 = vmatpush.bf16.msrb.mxu1 %v3179_v46 }
 0x25d   :  { %1272 = vmatpush.bf16.msrb.mxu0 %v1023_v63  ;;  %1344 = vmatpush.bf16.msrb.mxu1 %v3178_v48  ;;  %v3241_v48 = vld [vmem:[%s4033_s6] ss:$0 sm:$0xff] }
 0x261   :  { %1345 = vmatpush.bf16.msrb.mxu1 %v3177_v53 }
 0x264   :  { %2625 = vmatmul.msk.bf16.gmra.mxu0 %vm1037_vm8, %v1036_v35  ;;  %2634 = vmatmul.msk.bf16.gmra.mxu1 %vm1037_vm8, %v1087_v36 }
 0x265   :  { %1346 = vmatpush.bf16.msrb.mxu1 %v3176_v5 }
 0x269   :  { %1347 = vmatpush.bf16.msrb.mxu1 %v3175_v55 }
 0x274   :  { %2706 = vmatmul.msk.bf16.vlgmr.msrb.gmra.mxu0 %vm1037_vm8, %v3174_v40 }
 0x284   :  { %2707 = vmatmul.msk.bf16.gmra.mxu0 %vm1037_vm8, %v1258_v1  ;;  %v3199_v1 = vld [vmem:[%s4034_s8 + $0x48] sm:$0xff] }
 0x2d1   :  { %v1053_v2 = vpop.f32.mrf.mxu0  ;;  %v1103_v54 = vpop.f32.mrf.mxu1 }
 0x2d9   :  { %v1055_v56 = vpop.f32.mrf.mxu0  ;;  %v1105_v57 = vpop.f32.mrf.mxu1 }
 0x2da   :  { %v1062_v58 = vpack.c.bf16 %v1055_v56, %v1053_v2  ;;  %v1112_v59 = vpack.c.bf16 %v1105_v57, %v1103_v54 }
 0x2dc   :  { %2671 = vmatmul.msk.bf16.vlgmr.msra.gmra.mxu2 %vm144_vm0, %v1112_v59  ;;  %2697 = vmatmul.msk.bf16.vlgmr.msra.gmra.mxu3 %vm144_vm0, %v1062_v58 }
 0x2dd   :  { %1615 = vmatpush.bf16.msra.mxu2 %v3201_v41  ;;  %v3210_v41 = vld [vmem:[%s4034_s8 + $0x90] sm:$0xff] }
 0x2e1   :  { %v1058_v60 = vpop.f32.mrf.mxu0  ;;  %v1108_v61 = vpop.f32.mrf.mxu1  ;;  %1616 = vmatpush.bf16.msra.mxu2 %v3200_v42 }
 0x2e2   :  { %v1063_v62 = vpack.c.bf16 %v1058_v60, %v1058_v60  ;;  %v1113_v0 = vpack.c.bf16 %v1108_v61, %v1108_v61 }
 0x2e5   :  { %1617 = vmatpush.bf16.msra.mxu2 %v3199_v1 }
 0x2e9   :  { %v1060_v9 = vpop.f32.mrf.mxu0  ;;  %v1110_v49 = vpop.f32.mrf.mxu1  ;;  %1618 = vmatpush.bf16.msra.mxu2 %v3198_v4 }
 0x2ea   :  { %v3193_v9 = vld [vmem:[%s4034_s8 + $0x20] sm:$0xff] }
 0x2ec   :  { %2672 = vmatmul.msk.bf16.gmra.mxu2 %vm144_vm0, %v1113_v0  ;;  %2698 = vmatmul.msk.bf16.gmra.mxu3 %vm144_vm0, %v1063_v62  ;;  %v3194_v62 = vld [vmem:[%s4034_s8 + $0x28] sm:$0xff] }
 0x2ed   :  { %1619 = vmatpush.bf16.msra.mxu2 %v3197_v43  ;;  %1668 = vmatpush.bf16.msra.mxu3 %v3194_v62 }
 0x2f1   :  { %v1274_v51 = vpop.f32.mrf.mxu0  ;;  %1620 = vmatpush.bf16.msra.mxu2 %v3196_v44  ;;  %1669 = vmatpush.bf16.msra.mxu3 %v3193_v9 }
 0x2f5   :  { %1670 = vmatpush.bf16.msra.mxu3 %v3192_v17  ;;  %v3218_v17 = vld [vmem:[%s4038_s11 + $0x10] sm:$0xff] }
 0x2f9   :  { %v1276_v18 = vpop.f32.mrf.mxu0 }
 0x2fa   :  { %v1283_v19 = vpack.c.bf16 %v1276_v18, %v1274_v51 }
 0x2fc   :  { %2744 = vmatmul.msk.bf16.vlgmr.msrb.gmra.mxu1 %vm144_vm0, %v1283_v19  ;;  %2753 = vmatmul.msk.bf16.vlgmr.msrb.gmra.mxu2 %vm1037_vm8, %v3181_v12 }
 0x301   :  { %v1279_v13 = vpop.f32.mrf.mxu0 }
 0x302   :  { %v1284_v24 = vpack.c.bf16 %v1279_v13, %v1279_v13  ;;  %v2795_v13 = vld [vmem:[%s4035_s7] sm:$0xf] }
 0x309   :  { %v1281_v11 = vpop.f32.mrf.mxu0 }
 0x30c   :  { %2745 = vmatmul.msk.bf16.gmra.mxu1 %vm144_vm0, %v1284_v24  ;;  %2754 = vmatmul.msk.bf16.gmra.mxu2 %vm1037_vm8, %v1372_v10  ;;  %v3195_v24 = vld [vmem:[%s4035_s7 + $0x8] sm:$0x30]  ;;  %v2796_v10 = vor.u32 %v3188_v3, %v2795_v13  ;;  %v2956_v13 = vld [vmem:[%s4037_s10 + $0x4] sm:$0x7]  ;;  %v3227_v3 = vld [vmem:[%s4038_s11 + $0x58] sm:$0xff] }
 0x30d   :  { %v2803_v11 = vor.u32 %v3195_v24, %v2802_v7  ;;  %v3221_v7 = vld [vmem:[%s4038_s11 + $0x28] sm:$0xff]  ;;  %v3226_v24 = vld [vmem:[%s4038_s11 + $0x50] sm:$0xff] }
 0x35f   :  { %v1178_v6 = vpop.f32.mrf.mxu2  ;;  %v1238_v15 = vpop.f32.mrf.mxu3 }
 0x360   :  { %v1239_v20 = vadd.f32 %v1238_v15, %v1178_v6  ;;  %v3191_v6 = vld [vmem:[%s4034_s8 + $0x10] sm:$0xff]  ;;  %v3208_v15 = vld [vmem:[%s4034_s8 + $0x88] sm:$0xff] }
 0x361   :  { %1671 = vmatpush.bf16.msra.mxu3 %v3191_v6  ;;  %v3233_v6 = vld [vmem:[%s4038_s11 + $0x88] sm:$0xff] }
 0x367   :  { %v1180_v22 = vpop.f32.mrf.mxu2  ;;  %v1240_v8 = vpop.f32.mrf.mxu3 }
 0x368   :  { %v1241_v26 = vadd.f32 %v1240_v8, %v1180_v22  ;;  %v3206_v22 = vld [vmem:[%s4034_s8 + $0x78] sm:$0xff]  ;;  %v3205_v8 = vld [vmem:[%s4034_s8 + $0x70] sm:$0xff] }
 0x36f   :  { %v1183_v27 = vpop.f32.mrf.mxu2  ;;  %v1243_v30 = vpop.f32.mrf.mxu3 }
 0x370   :  { %v1244_v23 = vadd.f32 %v1243_v30, %v1183_v27  ;;  %v3203_v27 = vld [vmem:[%s4034_s8 + $0x60] sm:$0xff] }
 0x377   :  { %v1185_v47 = vpop.f32.mrf.mxu2  ;;  %v1245_v14 = vpop.f32.mrf.mxu3 }
 0x379   :  { %v1349_v63 = vpop.f32.mrf.mxu1 }
 0x37a   :  { %v1358_v31 = vadd.f32 %v1349_v63, %v1239_v20  ;;  %v3190_v20 = vld [vmem:[%s4034_s8 + $0x8] sm:$0xff] }
 0x37b   :  { %1672 = vmatpush.bf16.msra.mxu3 %v3190_v20  ;;  %v3224_v20 = vld [vmem:[%s4038_s11 + $0x40] sm:$0xff] }
 0x37f   :  { %v1388_v32 = vpop.f32.mrf.mxu2  ;;  %1673 = vmatpush.bf16.msra.mxu3 %v3189_v52  ;;  %v3216_v52 = vld [vmem:[%s4038_s11] sm:$0xff] }
 0x381   :  { %v1351_v33 = vpop.f32.mrf.mxu1 }
 0x382   :  { %v1359_v28 = vadd.f32 %v1351_v33, %v1241_v26  ;;  %v3204_v26 = vld [vmem:[%s4034_s8 + $0x68] sm:$0xff]  ;;  %v2915_v33 = vld [vmem:[%s4035_s7 + $0x18] sm:$0xf] }
 0x387   :  { %v1390_v29 = vpop.f32.mrf.mxu2 }
 0x388   :  { %v1397_v34 = vpack.c.bf16 %v1390_v29, %v1388_v32 }
 0x389   :  { %v1354_v35 = vpop.f32.mrf.mxu1 }
 0x38a   :  { %v1360_v36 = vadd.f32 %v1354_v35, %v1244_v23  ;;  %2791 = vmatmul.msk.bf16.vlgmr.msrb.gmra.mxu3 %vm144_vm0, %v1397_v34 }
 0x38f   :  { %v1393_v37 = vpop.f32.mrf.mxu2 }
 0x390   :  { %v1398_v39 = vpack.c.bf16 %v1393_v37, %v1393_v37  ;;  %v3214_v37 = vld [vmem:[%s4034_s8 + $0xb0] sm:$0xff] }
 0x391   :  { %v1356_v38 = vpop.f32.mrf.mxu1 }
 0x392   :  { %v3213_v38 = vld [vmem:[%s4034_s8 + $0xa8] sm:$0xff] }
 0x397   :  { %v1395_v40 = vpop.f32.mrf.mxu2 }
 0x398   :  { %v3211_v40 = vld [vmem:[%s4034_s8 + $0x98] sm:$0xff] }
 0x39a   :  { %2792 = vmatmul.msk.bf16.gmra.mxu3 %vm144_vm0, %v1398_v39  ;;  %v3212_v39 = vld [vmem:[%s4034_s8 + $0xa0] sm:$0xff] }
 0x40d   :  { %v1463_v45 = vpop.f32.mrf.mxu3 }
 0x40e   :  { %v1472_v46 = vadd.f32 %v1463_v45, %v1358_v31 }
 0x410   :  { %v1479_v53 = vadd.f32 %v3241_v48, %v1472_v46 }
 0x412   :  { %v1485_v5 = vmul.f32 0.2, %v1479_v53  ;;  %vm1482_vm9 = vcmp.ge.f32.partialorder %v1479_v53, 0.0 }
 0x414   :  { %v1488_v57 = vsel %vm1482_vm9, %v1479_v53, %v1485_v5 }
 0x415   :  { %v1465_v2 = vpop.f32.mrf.mxu3 }
 0x416   :  { %v1473_v54 = vadd.f32 %v1465_v2, %v1359_v28  ;;  %v3209_v28 = vld [vmem:[%s4035_s7 + $0x18] sm:$0x30] }
 0x417   :  { %v2916_v29 = vor.u32 %v3209_v28, %v2915_v33  ;;  %v3234_v33 = vld [vmem:[%s4038_s11 + $0x90] sm:$0xff] }
 0x418   :  { %v1480_v55 = vadd.f32 %v3241_v48, %v1473_v54 }
 0x41a   :  { %vm1483_vm10 = vcmp.ge.f32.partialorder %v1480_v55, 0.0  ;;  %v1486_v56 = vmul.f32 0.2, %v1480_v55 }
 0x41c   :  { %v1489_v58 = vsel %vm1483_vm10, %v1480_v55, %v1486_v56  ;;  %v3242_v55 = vld [vmem:[%s4036_s9] ss:$0 sm:$0xff] }
 0x41d   :  { %v1468_v59 = vpop.f32.mrf.mxu3  ;;  %v1491_v60 = vpack.c.bf16 %v1489_v58, %v1488_v57 }
 0x41e   :  { %v1474_v61 = vadd.f32 %v1468_v59, %v1360_v36  ;;  %v3215_v36 = vld [vmem:[%s4034_s8 + $0xb8] sm:$0xff] }
 0x41f   :  { %1854 = vmatpush.bf16.msrb.mxu3 %v3215_v36 }
 0x420   :  { %v1481_v0 = vadd.f32 %v3241_v48, %v1474_v61 }
 0x422   :  { %vm1484_vm11 = vcmp.ge.f32.partialorder %v1481_v0, 0.0  ;;  %v1487_v49 = vmul.f32 0.2, %v1481_v0 }
 0x423   :  { %1855 = vmatpush.bf16.msrb.mxu3 %v3214_v37 }
 0x424   :  { %v1490_v51 = vsel %vm1484_vm11, %v1481_v0, %v1487_v49 }
 0x425   :  { %v1492_v12 = vpack.c.bf16 %v1490_v51, %v1490_v51  ;;  %v1470_v18 = vpop.f32.mrf.mxu3 }
 0x427   :  { %v1506_v19 = vsel %vm1504_vm12, %v1492_v12, 0  ;;  %1856 = vmatpush.bf16.msrb.mxu3 %v3213_v38 }
 0x428   :  { %1514 = vmatpush.bf16.msra.mxu0 %v1506_v19  ;;  %1552 = vmatpush.bf16.msra.mxu1 %v1506_v19 }
 0x429   :  { %1791 = vmatpush.bf16.msrb.mxu2 %v1506_v19 }
 0x42b   :  { %1857 = vmatpush.bf16.msrb.mxu3 %v3212_v39 }
 0x42c   :  { %1515 = vmatpush.bf16.msra.mxu0 %v1491_v60  ;;  %1553 = vmatpush.bf16.msra.mxu1 %v1491_v60 }
 0x42d   :  { %1792 = vmatpush.bf16.msrb.mxu2 %v1491_v60 }
 0x42f   :  { %2797 = vmatmul.msk.bf16.vlgmr.msra.gmra.mxu0 %vm1500_vm13, %v2796_v10  ;;  %2804 = vmatmul.msk.bf16.vlgmr.msra.gmra.mxu1 %vm1500_vm13, %v2803_v11  ;;  %v3220_v10 = vld [vmem:[%s4038_s11 + $0x20] sm:$0xff]  ;;  %v3225_v11 = vld [vmem:[%s4038_s11 + $0x48] sm:$0xff] }
 0x430   :  { %1697 = vmatpush.bf16.msrb.mxu0 %v1506_v19  ;;  %1760 = vmatpush.bf16.msrb.mxu1 %v3208_v15  ;;  %v1881_v19 = vld [vmem:[%s4037_s10] sm:$0x7]  ;;  %v3217_v15 = vld [vmem:[%s4038_s11 + $0x8] sm:$0xff] }
 0x431   :  { %1858 = vmatpush.bf16.msrb.mxu3 %v3211_v40 }
 0x434   :  { %1698 = vmatpush.bf16.msrb.mxu0 %v1491_v60  ;;  %1761 = vmatpush.bf16.msrb.mxu1 %v3207_v21  ;;  %v3232_v21 = vld [vmem:[%s4038_s11 + $0x80] sm:$0xff] }
 0x435   :  { %1859 = vmatpush.bf16.msrb.mxu3 %v3210_v41 }
 0x438   :  { %1762 = vmatpush.bf16.msrb.mxu1 %v3206_v22  ;;  %v3223_v22 = vld [vmem:[%s4038_s11 + $0x38] sm:$0xff] }
 0x43c   :  { %1763 = vmatpush.bf16.msrb.mxu1 %v3205_v8  ;;  %v3231_v8 = vld [vmem:[%s4038_s11 + $0x78] sm:$0xff] }
 0x43f   :  { %2873 = vmatmul.msk.bf16.vlgmr.msrb.gmra.mxu0 %vm1500_vm13, %v2872_v16  ;;  %v3219_v16 = vld [vmem:[%s4038_s11 + $0x18] sm:$0xff] }
 0x440   :  { %1764 = vmatpush.bf16.msrb.mxu1 %v3204_v26  ;;  %v3222_v26 = vld [vmem:[%s4038_s11 + $0x30] sm:$0xff] }
 0x444   :  { %1765 = vmatpush.bf16.msrb.mxu1 %v3203_v27  ;;  %v3230_v27 = vld [vmem:[%s4038_s11 + $0x70] sm:$0xff] }
 0x448   :  { %1989 = vmatpush.bf16.msra.mxu1 %v3227_v3 }
 0x44c   :  { %1990 = vmatpush.bf16.msra.mxu1 %v3226_v24 }
 0x450   :  { %1991 = vmatpush.bf16.msra.mxu1 %v3225_v11 }
 0x454   :  { %1992 = vmatpush.bf16.msra.mxu1 %v3224_v20 }
 0x458   :  { %1993 = vmatpush.bf16.msra.mxu1 %v3223_v22 }
 0x45c   :  { %1994 = vmatpush.bf16.msra.mxu1 %v3222_v26 }
 0x4ac   :  { %v1517_v30 = vpop.f32.mrf.mxu0  ;;  %v1555_v23 = vpop.f32.mrf.mxu1 }
 0x4b4   :  { %v1519_v47 = vpop.f32.mrf.mxu0  ;;  %v1557_v14 = vpop.f32.mrf.mxu1 }
 0x4b5   :  { %v1522_v63 = vpack.c.bf16 %v1519_v47, %v1517_v30  ;;  %v1560_v31 = vpack.c.bf16 %v1557_v14, %v1555_v23  ;;  %v3239_v30 = vld [vmem:[%s4038_s11 + $0xb8] sm:$0xff]  ;;  %v3229_v23 = vld [vmem:[%s4038_s11 + $0x68] sm:$0xff]  ;;  %v3238_v47 = vld [vmem:[%s4038_s11 + $0xb0] sm:$0xff] }
 0x4b6   :  { %v3228_v14 = vld [vmem:[%s4038_s11 + $0x60] sm:$0xff] }
 0x4b7   :  { %2841 = vmatmul.msk.bf16.vlgmr.msra.gmra.mxu2 %vm144_vm0, %v1560_v31  ;;  %2866 = vmatmul.msk.bf16.vlgmr.msra.gmra.mxu3 %vm144_vm0, %v1522_v63  ;;  %v3237_v63 = vld [vmem:[%s4038_s11 + $0xa8] sm:$0xff]  ;;  %v3236_v31 = vld [vmem:[%s4038_s11 + $0xa0] sm:$0xff] }
 0x4b8   :  { %2041 = vmatpush.bf16.msra.mxu3 %v3221_v7 }
 0x4bc   :  { %v1700_v32 = vpop.f32.mrf.mxu0  ;;  %2042 = vmatpush.bf16.msra.mxu3 %v3220_v10 }
 0x4c0   :  { %2043 = vmatpush.bf16.msra.mxu3 %v3219_v16 }
 0x4c4   :  { %v1702_v34 = vpop.f32.mrf.mxu0  ;;  %2044 = vmatpush.bf16.msra.mxu3 %v3218_v17 }
 0x4c5   :  { %v1705_v35 = vpack.c.bf16 %v1702_v34, %v1700_v32  ;;  %v3235_v32 = vld [vmem:[%s4038_s11 + $0x98] sm:$0xff] }
 0x4c7   :  { %2910 = vmatmul.msk.bf16.vlgmr.msrb.gmra.mxu1 %vm144_vm0, %v1705_v35  ;;  %2917 = vmatmul.msk.bf16.vlgmr.msrb.gmra.mxu2 %vm1500_vm13, %v2916_v29 }
 0x4c8   :  { %2045 = vmatpush.bf16.msra.mxu3 %v3217_v15  ;;  %2210 = vmatpush.bf16.msrb.mxu1 %v3239_v30 }
 0x4cc   :  { %2046 = vmatpush.bf16.msra.mxu3 %v3216_v52  ;;  %2211 = vmatpush.bf16.msrb.mxu1 %v3238_v47 }
 0x4d0   :  { %2212 = vmatpush.bf16.msrb.mxu1 %v3237_v63 }
 0x4d4   :  { %2213 = vmatpush.bf16.msrb.mxu1 %v3236_v31 }
 0x4d8   :  { %2214 = vmatpush.bf16.msrb.mxu1 %v3235_v32 }
 0x4dc   :  { %2215 = vmatpush.bf16.msrb.mxu1 %v3234_v33 }
 0x53a   :  { %v1622_v42 = vpop.f32.mrf.mxu2  ;;  %v1675_v45 = vpop.f32.mrf.mxu3 }
 0x53b   :  { %v1676_v53 = vadd.f32 %v1675_v45, %v1622_v42 }
 0x542   :  { %v1624_v1 = vpop.f32.mrf.mxu2  ;;  %v1677_v46 = vpop.f32.mrf.mxu3 }
 0x543   :  { %v1678_v57 = vadd.f32 %v1677_v46, %v1624_v1 }
 0x544   :  { %v1767_v48 = vpop.f32.mrf.mxu1 }
 0x545   :  { %v1772_v54 = vadd.f32 %v1767_v48, %v1676_v53 }
 0x54a   :  { %v1794_v4 = vpop.f32.mrf.mxu2 }
 0x54c   :  { %v1769_v56 = vpop.f32.mrf.mxu1 }
 0x54d   :  { %v1773_v58 = vadd.f32 %v1769_v56, %v1678_v57 }
 0x552   :  { %v1796_v43 = vpop.f32.mrf.mxu2 }
 0x553   :  { %v1799_v44 = vpack.c.bf16 %v1796_v43, %v1794_v4 }
 0x555   :  { %2954 = vmatmul.msk.bf16.vlgmr.msrb.gmra.mxu3 %vm144_vm0, %v1799_v44 }
 0x5d8   :  { %v1861_v2 = vpop.f32.mrf.mxu3 }
 0x5d9   :  { %v1866_v5 = vadd.f32 %v1861_v2, %v1772_v54  ;;  %v3243_v54 = vld [vmem:[%s4039_s12] ss:$0 sm:$0xff] }
 0x5db   :  { %v1872_v59 = vadd.f32 %v3242_v55, %v1866_v5 }
 0x5dd   :  { %v1876_v62 = vmul.f32 0.2, %v1872_v59  ;;  %vm1874_vm14 = vcmp.ge.f32.partialorder %v1872_v59, 0.0 }
 0x5df   :  { %v1878_v49 = vsel %vm1874_vm14, %v1872_v59, %v1876_v62 }
 0x5e0   :  { %v1863_v60 = vpop.f32.mrf.mxu3 }
 0x5e1   :  { %v1867_v61 = vadd.f32 %v1863_v60, %v1773_v58 }
 0x5e3   :  { %v1873_v0 = vadd.f32 %v3242_v55, %v1867_v61  ;;  %v2232_v61 = vld [vmem:[%s4040_s13] sm:$0x3f] }
 0x5e5   :  { %vm1875_vm15 = vcmp.ge.f32.partialorder %v1873_v0, 0.0  ;;  %v1877_v9 = vmul.f32 0.2, %v1873_v0 }
 0x5e7   :  { %v1879_v51 = vsel %vm1875_vm15, %v1873_v0, %v1877_v9  ;;  %v2234_v9 = vld [vmem:[%s4041_s14] sm:$0x3] }
 0x5e8   :  { %v1880_v12 = vpack.c.bf16 %v1879_v51, %v1878_v49 }
 0x5ea   :  { %v1888_v18 = vsel %vm1886_vm1, %v1880_v12, 0 }
 0x5eb   :  { %1897 = vmatpush.bf16.msra.mxu0 %v1888_v18  ;;  %1928 = vmatpush.bf16.msra.mxu2 %v1888_v18 }
 0x5ee   :  { %2955 = vmatmul.msk.bf16.vlgmr.msra.gmra.mxu0 %vm1882_vm2, %v1881_v19  ;;  %2957 = vmatmul.msk.bf16.vlgmr.msra.gmra.mxu2 %vm1882_vm2, %v2956_v13 }
 0x5ef   :  { %2064 = vmatpush.bf16.msrb.mxu0 %v1888_v18  ;;  %2125 = vmatpush.bf16.msrb.mxu2 %v3233_v6 }
 0x5f3   :  { %2149 = vmatpush.bf16.msra.mxu0 %v1888_v18  ;;  %2126 = vmatpush.bf16.msrb.mxu2 %v3232_v21 }
 0x5f7   :  { %2127 = vmatpush.bf16.msrb.mxu2 %v3231_v8 }
 0x5fb   :  { %2128 = vmatpush.bf16.msrb.mxu2 %v3230_v27 }
 0x5fe   :  { %3021 = vmatmul.msk.bf16.vlgmr.msrb.gmra.mxu0 %vm1882_vm2, %v3020_v25 }
 0x5ff   :  { %2129 = vmatpush.bf16.msrb.mxu2 %v3229_v23 }
 0x603   :  { %2130 = vmatpush.bf16.msrb.mxu2 %v3228_v14 }
 0x60e   :  { %3060 = vmatmul.msk.bf16.vlgmr.msra.gmra.mxu0 %vm1882_vm2, %v3059_v50 }
 0x66b   :  { %v1899_v28 = vpop.f32.mrf.mxu0 }
 0x66c   :  { %v1903_v29 = vpack.c.bf16 %v1899_v28, %v1899_v28 }
 0x66e   :  { %3019 = vmatmul.msk.bf16.vlgmr.msra.gmra.mxu3 %vm144_vm0, %v1903_v29 }
 0x671   :  { %v1930_v34 = vpop.f32.mrf.mxu2 }
 0x672   :  { %v1934_v35 = vpack.c.bf16 %v1930_v34, %v1930_v34 }
 0x673   :  { %v1901_v36 = vpop.f32.mrf.mxu0 }
 0x674   :  { %2994 = vmatmul.msk.bf16.vlgmr.msra.gmra.mxu1 %vm144_vm0, %v1934_v35 }
 0x679   :  { %v1932_v37 = vpop.f32.mrf.mxu2 }
 0x67b   :  { %v2066_v38 = vpop.f32.mrf.mxu0 }
 0x67c   :  { %v2070_v39 = vpack.c.bf16 %v2066_v38, %v2066_v38 }
 0x67e   :  { %3058 = vmatmul.msk.bf16.vlgmr.msrb.gmra.mxu2 %vm144_vm0, %v2070_v39 }
 0x683   :  { %v2068_v40 = vpop.f32.mrf.mxu0 }
 0x68b   :  { %v2151_v41 = vpop.f32.mrf.mxu0 }
 0x68c   :  { %v2155_v42 = vpack.c.bf16 %v2151_v41, %v2151_v41 }
 0x68e   :  { %3097 = vmatmul.msk.bf16.vlgmr.msrb.gmra.mxu1 %vm144_vm0, %v2155_v42  ;;  %vm2235_vm0 = vcmask 48128  }
 0x693   :  { %v2153_v1 = vpop.f32.mrf.mxu0 }
 0x6f1   :  { %v1996_v4 = vpop.f32.mrf.mxu1  ;;  %v2048_v43 = vpop.f32.mrf.mxu3 }
 0x6f2   :  { %v2049_v48 = vadd.f32 %v2048_v43, %v1996_v4 }
 0x6f9   :  { %v1998_v44 = vpop.f32.mrf.mxu1  ;;  %v2050_v45 = vpop.f32.mrf.mxu3 }
 0x701   :  { %v2132_v46 = vpop.f32.mrf.mxu2 }
 0x702   :  { %v2136_v2 = vadd.f32 %v2132_v46, %v2049_v48 }
 0x709   :  { %v2134_v53 = vpop.f32.mrf.mxu2 }
 0x70b   :  { %v2217_v5 = vpop.f32.mrf.mxu1 }
 0x70c   :  { %v2221_v55 = vadd.f32 %v2217_v5, %v2136_v2 }
 0x70e   :  { %v2226_v56 = vadd.f32 %v3243_v54, %v2221_v55 }
 0x710   :  { %vm2227_vm3 = vcmp.ge.f32.partialorder %v2226_v56, 0.0  ;;  %v2228_v57 = vmul.f32 0.2, %v2226_v56 }
 0x712   :  { %v2229_v58 = vsel %vm2227_vm3, %v2226_v56, %v2228_v57 }
 0x713   :  { %v2230_v59 = vpack.c.bf16 %v2229_v58, %v2229_v58  ;;  %v2219_v60 = vpop.f32.mrf.mxu1 }
 0x715   :  { %v2231_v62 = vunpack.c.l.bf16 %v2230_v59 }
 0x717   :  { %v2233_v0 = vmul.f32 %v2232_v61, %v2231_v62 }
 0x719   :  { %3098 = vmatpush.msk.msrb.mxu3 %vm1886_vm1, %v2233_v0 }
 0x71a   :  { %3099 = vmatmul.msk.f32.vlgmr.msrb.gmra.mxu3 %vm2235_vm0, %v2234_v9 }
 0x79d   :  { %v2259_v49 = vpop.f32.mrf.mxu3 }
 0x79e   :  { %v2263_v51 = vsel %vm2262_vm4, %v2259_v49, 0.0 }
 0x79f   :  { %2264 = vadd.xlane.f32.xlu0 %v2263_v51 }
 0x812   :  { %v2265_v12 = vpop.xlane.xlu0 %2264 }
 0x813   :  { %2267 = vst.msk [vmem:[%s4042_s15] sm:$0x3] %vm2266_vm5, %v2265_v12 }

</bundles_post_ra>
